<compile_context>
chip_gen: v6e
topology: v6e:2x2x1
jax: 0.10.0
libtpu: 0.0.40
codegen_flags: <defaults>
</compile_context>

<pallas_src>
import functools

import jax
import jax.numpy as jnp
from jax import lax
from jax.experimental import pallas as pl
from jax.experimental.pallas import tpu as pltpu


def _mlp_kernel(x_ref, w1t_ref, b1_ref, w2_ref, b2_ref, w3_ref, b3_ref, o_ref):
    # Shapes (batch on the sublane axis, natural [batch, feature] layout):
    #   x_ref  : [Bt, d_in]
    #   w1t_ref: [d_in, H1]   (= w1.T)      b1_ref: [1, H1]
    #   w2_ref : [H2, H1]     (PyTorch)     b2_ref: [1, H2]
    #   w3_ref : [d_out, H2]  (PyTorch)     b3_ref: [1, d_out]
    #   o_ref  : [Bt, d_out]
    x = x_ref[...]
    w1t = w1t_ref[...]

    # Layer 1: Linear(d_in=2 -> H1) + ReLU as a VPU broadcast-FMA (a K=2
    # matmul would leave the MXU essentially idle).
    h = b1_ref[...]                                   # [1, H1], broadcasts on first add
    for k in range(x.shape[1]):                       # d_in == 2, static
        h = h + x[:, k:k + 1] * w1t[k:k + 1, :]       # [Bt,1]*[1,H1] -> [Bt,H1]
    h = jnp.maximum(h, 0.0)

    # Layer 2: Linear(H1 -> H2) + ReLU on the MXU, f32 accumulation.
    # dot_general contracts dim 1 of both operands, i.e. h @ w2.T with w2 kept
    # in PyTorch [out, in] layout (no transpose needed anywhere).
    h = lax.dot_general(h, w2_ref[...], (((1,), (1,)), ((), ())),
                        preferred_element_type=jnp.float32)
    h = jnp.maximum(h + b2_ref[...], 0.0)

    # Output layer: Linear(H2 -> d_out=2), no activation.  Same trans-B
    # contraction; result is already the [Bt, d_out] output tile, so there is
    # no concatenate / temporary relayout before the store.
    o = lax.dot_general(h, w3_ref[...], (((1,), (1,)), ((), ())),
                        preferred_element_type=jnp.float32)
    o_ref[...] = (o + b3_ref[...]).astype(o_ref.dtype)


def _round_up(x, m):
    return ((x + m - 1) // m) * m


@functools.partial(jax.jit, static_argnames=("batch_tile", "max_batch_tile"))
def mlp_forward(x, w1, b1, w2, b2, w3, b3, *, batch_tile=None, max_batch_tile=2048):
    """Fused MLP forward.

    Weights/biases are in PyTorch nn.Linear layout: w*: [out, in], b*: [out].
    x: [batch, 2] -> returns [batch, 2].

    Tiling: if `batch_tile` is None, the whole (sublane-padded) batch is one
    grid step when it fits under `max_batch_tile`; larger batches use
    `max_batch_tile`-row steps so the "parallel" grid axis can shard across
    TensorCores on v7x while keeping per-step work well above the ~0.35 us
    fixed step overhead.
    """
    n, d_in = x.shape
    h1 = w1.shape[0]
    h2 = w2.shape[0]
    d_out = w3.shape[0]

    if batch_tile is None:
        n8 = _round_up(n, 8)                       # sublane granularity
        batch_tile = n8 if n8 <= max_batch_tile else max_batch_tile
    assert batch_tile % 8 == 0, "batch_tile must be a multiple of 8"

    n_pad = _round_up(n, batch_tile)
    x_p = x if n_pad == n else jnp.pad(x, ((0, n_pad - n), (0, 0)))

    # Tiny one-time parameter relayouts (256 B / 128 B each) — the data-sized
    # pad/transpose/slice HLOs of the old wrapper are gone.
    w1t = w1.T                                     # [d_in, h1]
    b1k = b1.reshape(1, h1)
    b2k = b2.reshape(1, h2)
    b3k = b3.reshape(1, d_out)

    grid = (n_pad // batch_tile,)

    in_specs = [
        pl.BlockSpec((batch_tile, d_in), lambda i: (i, 0)),   # x tile
        pl.BlockSpec((d_in, h1), lambda i: (0, 0)),           # W1^T (whole)
        pl.BlockSpec((1, h1), lambda i: (0, 0)),              # b1
        pl.BlockSpec((h2, h1), lambda i: (0, 0)),             # W2 (whole)
        pl.BlockSpec((1, h2), lambda i: (0, 0)),              # b2
        pl.BlockSpec((d_out, h2), lambda i: (0, 0)),          # W3 (whole)
        pl.BlockSpec((1, d_out), lambda i: (0, 0)),           # b3
    ]
    out_spec = pl.BlockSpec((batch_tile, d_out), lambda i: (i, 0))

    flops = 2 * n_pad * (d_in * h1 + h1 * h2 + h2 * d_out)
    bytes_accessed = 4 * (n_pad * (d_in + d_out)
                          + d_in * h1 + h1 + h1 * h2 + h2 + h2 * d_out + d_out)

    out = pl.pallas_call(
        _mlp_kernel,
        out_shape=jax.ShapeDtypeStruct((n_pad, d_out), x.dtype),
        grid_spec=pl.GridSpec(
            grid=grid,
            in_specs=in_specs,
            out_specs=out_spec,
        ),
        compiler_params=pltpu.CompilerParams(
            dimension_semantics=("parallel",),
        ),
        cost_estimate=pl.CostEstimate(
            flops=int(flops), transcendentals=0, bytes_accessed=int(bytes_accessed)),
    )(x_p, w1t, b1k, w2, b2k, w3, b3k)

    return out if n_pad == n else out[:n, :]


def init_linear(key, fan_in, fan_out):
    """nn.Linear default init U(-1/sqrt(fan_in), 1/sqrt(fan_in)), PyTorch layout."""
    kw, kb = jax.random.split(key)
    bound = 1.0 / float(fan_in) ** 0.5
    w = jax.random.uniform(kw, (fan_out, fan_in), jnp.float32, -bound, bound)
    b = jax.random.uniform(kb, (fan_out,), jnp.float32, -bound, bound)
    return w, b


def reference_forward(x, w1, b1, w2, b2, w3, b3):
    h = jnp.maximum(x @ w1.T + b1, 0.0)
    h = jnp.maximum(h @ w2.T + b2, 0.0)
    return h @ w3.T + b3


if __name__ == "__main__":
    # MLP(hidden_layers=[32, 32]): Linear(2,32) -> ReLU -> Linear(32,32) -> ReLU -> Linear(32,2)
    hidden_layers = (32, 32)
    d_in, d_out = 2, 2
    batch = 512   # auto-tiling -> a single grid step (no pointless 2x split)

    key = jax.random.PRNGKey(0)
    kx, k1, k2, k3 = jax.random.split(key, 4)

    x = jax.random.normal(kx, (batch, d_in), jnp.float32)
    w1, b1 = init_linear(k1, d_in, hidden_layers[0])
    w2, b2 = init_linear(k2, hidden_layers[0], hidden_layers[1])
    w3, b3 = init_linear(k3, hidden_layers[1], d_out)

    out = jax.block_until_ready(mlp_forward(x, w1, b1, w2, b2, w3, b3))
    ref = reference_forward(x, w1, b1, w2, b2, w3, b3)
    assert out.shape == (batch, d_out)
    assert jnp.allclose(out, ref, atol=1e-5, rtol=1e-5), "mismatch vs. reference"

    # Ragged small batch (single-step path, no padding HLOs needed).
    x_small = x[:200]
    out_small = jax.block_until_ready(mlp_forward(x_small, w1, b1, w2, b2, w3, b3))
    ref_small = reference_forward(x_small, w1, b1, w2, b2, w3, b3)
    assert out_small.shape == (200, d_out)
    assert jnp.allclose(out_small, ref_small, atol=1e-5, rtol=1e-5), "mismatch (ragged)"

    # Large batch: exercises the multi-step grid (2048-row tiles, "parallel"
    # axis usable by both v7x TensorCores) and the zero-pad path.
    x_big = jax.random.normal(kx, (5000, d_in), jnp.float32)
    out_big = jax.block_until_ready(mlp_forward(x_big, w1, b1, w2, b2, w3, b3))
    ref_big = reference_forward(x_big, w1, b1, w2, b2, w3, b3)
    assert out_big.shape == (5000, d_out)
    assert jnp.allclose(out_big, ref_big, atol=1e-5, rtol=1e-5), "mismatch (large)"

    print("KERNEL_OK")
</pallas_src>

<mosaic_0001>
module attributes {stable_mosaic.version = 11 : i64} {
  func.func @_mlp_kernel(%arg0: i32, %arg1: memref<512x2xf32, #tpu.memory_space<vmem>>, %arg2: memref<2x32xf32, #tpu.memory_space<vmem>>, %arg3: memref<1x32xf32, #tpu.memory_space<vmem>>, %arg4: memref<32x32xf32, #tpu.memory_space<vmem>>, %arg5: memref<1x32xf32, #tpu.memory_space<vmem>>, %arg6: memref<2x32xf32, #tpu.memory_space<vmem>>, %arg7: memref<1x2xf32, #tpu.memory_space<vmem>>, %arg8: memref<512x2xf32, #tpu.memory_space<vmem>>) attributes {dimension_semantics = [#tpu.dimension_semantics<parallel>], iteration_bounds = array<i64: 1>, scalar_prefetch = 0 : i64, scratch_operands = 0 : i64, tpu.core_type = #tpu.core_type<tc>, window_params = [{transform_indices = @transform_0, window_bounds = array<i64: 512, 2>}, {pipeline_mode = #tpu.pipeline_mode<synchronous>, transform_indices = @transform_1, window_bounds = array<i64: 2, 32>}, {pipeline_mode = #tpu.pipeline_mode<synchronous>, transform_indices = @transform_2, window_bounds = array<i64: 1, 32>}, {pipeline_mode = #tpu.pipeline_mode<synchronous>, transform_indices = @transform_3, window_bounds = array<i64: 32, 32>}, {pipeline_mode = #tpu.pipeline_mode<synchronous>, transform_indices = @transform_4, window_bounds = array<i64: 1, 32>}, {pipeline_mode = #tpu.pipeline_mode<synchronous>, transform_indices = @transform_5, window_bounds = array<i64: 2, 32>}, {pipeline_mode = #tpu.pipeline_mode<synchronous>, transform_indices = @transform_6, window_bounds = array<i64: 1, 2>}, {transform_indices = @transform_7, window_bounds = array<i64: 512, 2>}]} {
    %c0 = arith.constant 0 : index
    %c0_0 = arith.constant 0 : index
    %0 = vector.load %arg1[%c0, %c0_0] : memref<512x2xf32, #tpu.memory_space<vmem>>, vector<512x2xf32>
    %c0_1 = arith.constant 0 : index
    %c0_2 = arith.constant 0 : index
    %1 = vector.load %arg2[%c0_1, %c0_2] : memref<2x32xf32, #tpu.memory_space<vmem>>, vector<2x32xf32>
    %c0_3 = arith.constant 0 : index
    %c0_4 = arith.constant 0 : index
    %2 = vector.load %arg3[%c0_3, %c0_4] : memref<1x32xf32, #tpu.memory_space<vmem>>, vector<1x32xf32>
    %3 = vector.extract_strided_slice %0 {offsets = [0, 0], sizes = [512, 1], strides = [1, 1]} : vector<512x2xf32> to vector<512x1xf32>
    %4 = vector.extract_strided_slice %1 {offsets = [0, 0], sizes = [1, 32], strides = [1, 1]} : vector<2x32xf32> to vector<1x32xf32>
    %5 = vector.broadcast %3 : vector<512x1xf32> to vector<512x32xf32>
    %6 = vector.broadcast %4 : vector<1x32xf32> to vector<512x32xf32>
    %7 = arith.mulf %5, %6 : vector<512x32xf32>
    %8 = vector.broadcast %2 : vector<1x32xf32> to vector<512x32xf32>
    %9 = arith.addf %8, %7 : vector<512x32xf32>
    %10 = vector.extract_strided_slice %0 {offsets = [0, 1], sizes = [512, 1], strides = [1, 1]} : vector<512x2xf32> to vector<512x1xf32>
    %11 = vector.extract_strided_slice %1 {offsets = [1, 0], sizes = [1, 32], strides = [1, 1]} : vector<2x32xf32> to vector<1x32xf32>
    %12 = vector.broadcast %10 : vector<512x1xf32> to vector<512x32xf32>
    %13 = vector.broadcast %11 : vector<1x32xf32> to vector<512x32xf32>
    %14 = arith.mulf %12, %13 : vector<512x32xf32>
    %15 = arith.addf %9, %14 : vector<512x32xf32>
    %cst = arith.constant 0.000000e+00 : f32
    %16 = vector.broadcast %cst : f32 to vector<512x32xf32>
    %17 = arith.maximumf %15, %16 : vector<512x32xf32>
    %c0_5 = arith.constant 0 : index
    %c0_6 = arith.constant 0 : index
    %18 = vector.load %arg4[%c0_5, %c0_6] : memref<32x32xf32, #tpu.memory_space<vmem>>, vector<32x32xf32>
    %cst_7 = arith.constant dense<0.000000e+00> : vector<512x32xf32>
    %19 = tpu.matmul %17, %18, %cst_7 {dimension_numbers = #tpu.dot_dimension_numbers<[1], [1], [0], [0], [0, 0, 1, 0], [], []>} : vector<512x32xf32>, vector<32x32xf32>, vector<512x32xf32> -> vector<512x32xf32>
    %c0_8 = arith.constant 0 : index
    %c0_9 = arith.constant 0 : index
    %20 = vector.load %arg5[%c0_8, %c0_9] : memref<1x32xf32, #tpu.memory_space<vmem>>, vector<1x32xf32>
    %21 = vector.broadcast %20 : vector<1x32xf32> to vector<512x32xf32>
    %22 = arith.addf %19, %21 : vector<512x32xf32>
    %cst_10 = arith.constant 0.000000e+00 : f32
    %23 = vector.broadcast %cst_10 : f32 to vector<512x32xf32>
    %24 = arith.maximumf %22, %23 : vector<512x32xf32>
    %c0_11 = arith.constant 0 : index
    %c0_12 = arith.constant 0 : index
    %25 = vector.load %arg6[%c0_11, %c0_12] : memref<2x32xf32, #tpu.memory_space<vmem>>, vector<2x32xf32>
    %cst_13 = arith.constant dense<0.000000e+00> : vector<512x2xf32>
    %26 = tpu.matmul %24, %25, %cst_13 {dimension_numbers = #tpu.dot_dimension_numbers<[1], [1], [0], [0], [0, 0, 1, 0], [], []>} : vector<512x32xf32>, vector<2x32xf32>, vector<512x2xf32> -> vector<512x2xf32>
    %c0_14 = arith.constant 0 : index
    %c0_15 = arith.constant 0 : index
    %27 = vector.load %arg7[%c0_14, %c0_15] : memref<1x2xf32, #tpu.memory_space<vmem>>, vector<1x2xf32>
    %28 = vector.broadcast %27 : vector<1x2xf32> to vector<512x2xf32>
    %29 = arith.addf %26, %28 : vector<512x2xf32>
    %c0_16 = arith.constant 0 : index
    %c0_17 = arith.constant 0 : index
    %30 = vector.load %arg8[%c0_16, %c0_17] : memref<512x2xf32, #tpu.memory_space<vmem>>, vector<512x2xf32>
    tpu.vector_store %arg8[%c0_16, %c0_17], %29 {strides = array<i32>} : memref<512x2xf32, #tpu.memory_space<vmem>>, vector<512x2xf32>,
    return
  }
  func.func @transform_0(%arg0: i32) -> (i32, i32) {
    %c0_i32 = arith.constant 0 : i32
    %c0_i32_0 = arith.constant 0 : i32
    return %arg0, %c0_i32 : i32, i32
  }
  func.func @transform_1(%arg0: i32) -> (i32, i32) {
    %c0_i32 = arith.constant 0 : i32
    %c0_i32_0 = arith.constant 0 : i32
    %c0_i32_1 = arith.constant 0 : i32
    return %c0_i32, %c0_i32_0 : i32, i32
  }
  func.func @transform_2(%arg0: i32) -> (i32, i32) {
    %c0_i32 = arith.constant 0 : i32
    %c0_i32_0 = arith.constant 0 : i32
    %c0_i32_1 = arith.constant 0 : i32
    return %c0_i32, %c0_i32_0 : i32, i32
  }
  func.func @transform_3(%arg0: i32) -> (i32, i32) {
    %c0_i32 = arith.constant 0 : i32
    %c0_i32_0 = arith.constant 0 : i32
    %c0_i32_1 = arith.constant 0 : i32
    return %c0_i32, %c0_i32_0 : i32, i32
  }
  func.func @transform_4(%arg0: i32) -> (i32, i32) {
    %c0_i32 = arith.constant 0 : i32
    %c0_i32_0 = arith.constant 0 : i32
    %c0_i32_1 = arith.constant 0 : i32
    return %c0_i32, %c0_i32_0 : i32, i32
  }
  func.func @transform_5(%arg0: i32) -> (i32, i32) {
    %c0_i32 = arith.constant 0 : i32
    %c0_i32_0 = arith.constant 0 : i32
    %c0_i32_1 = arith.constant 0 : i32
    return %c0_i32, %c0_i32_0 : i32, i32
  }
  func.func @transform_6(%arg0: i32) -> (i32, i32) {
    %c0_i32 = arith.constant 0 : i32
    %c0_i32_0 = arith.constant 0 : i32
    %c0_i32_1 = arith.constant 0 : i32
    return %c0_i32, %c0_i32_0 : i32, i32
  }
  func.func @transform_7(%arg0: i32) -> (i32, i32) {
    %c0_i32 = arith.constant 0 : i32
    %c0_i32_0 = arith.constant 0 : i32
    return %arg0, %c0_i32 : i32, i32
  }
}

</mosaic_0001>

<bundles_post_ra>
// kernel: mlp_forward.1
= control target key start
LH: loop header
LB: loop body
LE: loop exit
PB: predicated region body
PF: predicated region fallthrough
CT: control target
= control target key end

     0   :  { %v2864_v0 = vmov 1   ;;  %v2865_v7 = vmov 0   ;;  %vm1013_vm0 = vcmask 261120   ;;  %vm2255_vm1 = vcmask 15360   ;;  %s4114_s0 = inlined_call_operand.vmem [shape: f32[512,2], index: 0, kind: input, shape index: {}]   ;;  %s4115_s3 = inlined_call_operand.vmem [shape: f32[32,32], index: 3, kind: input, shape index: {}]   ;;  %s4116_s1 = inlined_call_operand.vmem [shape: f32[2,32], index: 1, kind: input, shape index: {}]   ;;  %s4117_s2 = inlined_call_operand.vmem [shape: f32[1,32], index: 2, kind: input, shape index: {}]   ;;  %s4118_s5 = inlined_call_operand.vmem [shape: f32[2,32], index: 5, kind: input, shape index: {}]   ;;  %s4119_s4 = inlined_call_operand.vmem [shape: f32[1,32], index: 4, kind: input, shape index: {}]   ;;  %s4120_s6 = inlined_call_operand.vmem [shape: f32[1,2], index: 6, kind: input, shape index: {}]   ;;  %s4121_s7 = inlined_call_operand.vmem [shape: f32[512,2], index: 7, kind: output, shape index: {}]  }
   0x1   :  { %2799 = vset.pattern.permute.xlu0 %v2864_v0  ;;  %2797 = vset.pattern.permute.xlu1 %v2864_v0  ;;  %v2911_v1 = vld [vmem:[%s4114_s0 + $0x10] sm:$0xff]  ;;  %v2916_v2 = vld [vmem:[%s4114_s0] sm:$0xff]  ;;  %v2928_v4 = vld [vmem:[%s4114_s0 + $0x8] sm:$0xff] }
   0x2   :  { %559 = vperm.xlu0 %2799, %v2911_v1   ;;  %551 = vperm.xlu1 %2797, %v2916_v2   ;;  %v2923_v3 = vld [vmem:[%s4114_s0 + $0x30] sm:$0xff]  ;;  %v29_v6 = vld [vmem:[%s4114_s0 + $0x18] sm:$0xff]  ;;  %v30_v10 = vld [vmem:[%s4114_s0 + $0x20] sm:$0xff] }
   0x3   :  { %v2935_v5 = vld [vmem:[%s4114_s0 + $0x50] sm:$0xff]  ;;  %v31_v14 = vld [vmem:[%s4114_s0 + $0x28] sm:$0xff]  ;;  %v33_v16 = vld [vmem:[%s4114_s0 + $0x38] sm:$0xff] }
   0x4   :  { %v2945_v8 = vld [vmem:[%s4114_s0 + $0x70] sm:$0xff]  ;;  %v34_v19 = vld [vmem:[%s4114_s0 + $0x40] sm:$0xff]  ;;  %v35_v23 = vld [vmem:[%s4114_s0 + $0x48] sm:$0xff] }
   0x5   :  { %v2952_v9 = vld [vmem:[%s4114_s0 + $0x90] sm:$0xff]  ;;  %v1005_v24 = vld [vmem:[%s4115_s3 + $0x18] sm:$0xff]  ;;  %v1003_v28 = vld [vmem:[%s4115_s3 + $0x8] sm:$0xff] }
   0x6   :  { %575 = vperm.xlu0 %2799, %v2923_v3   ;;  %555 = vperm.xlu1 %2797, %v2928_v4   ;;  %v2961_v11 = vld [vmem:[%s4114_s0 + $0xb0] sm:$0xff]  ;;  %v37_v26 = vld [vmem:[%s4114_s0 + $0x58] sm:$0xff]  ;;  %v38_v29 = vld [vmem:[%s4114_s0 + $0x60] sm:$0xff] }
   0x7   :  { %v2968_v12 = vld [vmem:[%s4114_s0 + $0xd0] sm:$0xff]  ;;  %2593 = vmatprep.subr.msk.mxu0 %vm1013_vm0, %v1005_v24  ;;  %v1002_v30 = vld [vmem:[%s4115_s3] sm:$0xff]  ;;  %v39_v31 = vld [vmem:[%s4114_s0 + $0x68] sm:$0xff] }
   0x8   :  { %v2975_v13 = vld [vmem:[%s4114_s0 + $0xf0] sm:$0xff]  ;;  %2594 = vmatpush3.xpose.msk.msra.mxu0 %vm1013_vm0, %v1005_v24  ;;  %v41_v32 = vld [vmem:[%s4114_s0 + $0x78] sm:$0xff]  ;;  %v42_v33 = vld [vmem:[%s4114_s0 + $0x80] sm:$0xff] }
   0x9   :  { %v2984_v15 = vld [vmem:[%s4114_s0 + $0x110] sm:$0xff]  ;;  %v43_v34 = vld [vmem:[%s4114_s0 + $0x88] sm:$0xff]  ;;  %v45_v36 = vld [vmem:[%s4114_s0 + $0x98] sm:$0xff] }
   0xa   :  { %591 = vperm.xlu0 %2799, %v2935_v5   ;;  %2798 = vset.pattern.permute.xlu1 %v2865_v7  ;;  %v2994_v17 = vld [vmem:[%s4114_s0 + $0x130] sm:$0xff]  ;;  %v47_v35 = vld [vmem:[%s4114_s0 + $0xa8] sm:$0xff]  ;;  %v46_v38 = vld [vmem:[%s4114_s0 + $0xa0] sm:$0xff] }
   0xb   :  { %109 = vperm.xlu1 %2798, %v29_v6   ;;  %v3001_v18 = vld [vmem:[%s4114_s0 + $0x150] sm:$0xff]  ;;  %v51_v37 = vld [vmem:[%s4114_s0 + $0xc8] sm:$0xff]  ;;  %v49_v43 = vld [vmem:[%s4114_s0 + $0xb8] sm:$0xff] }
   0xc   :  { %v3010_v20 = vld [vmem:[%s4114_s0 + $0x170] sm:$0xff]  ;;  %v3110_v39 = vld [vmem:[%s4114_s0 + $0xe8] sm:$0xff]  ;;  %v50_v50 = vld [vmem:[%s4114_s0 + $0xc0] sm:$0xff] }
   0xd   :  { %v3017_v21 = vld [vmem:[%s4114_s0 + $0x190] sm:$0xff]  ;;  %v3122_v42 = vld [vmem:[%s4114_s0 + $0x108] sm:$0xff]  ;;  %v53_v59 = vld [vmem:[%s4114_s0 + $0xd8] sm:$0xff] }
   0xe   :  { %607 = vperm.xlu0 %2799, %v2945_v8   ;;  %v3024_v22 = vld [vmem:[%s4114_s0 + $0x1b0] sm:$0xff]  ;;  %v3142_v48 = vld [vmem:[%s4114_s0 + $0x128] sm:$0xff] }
   0xf   :  { %2800 = vset.pattern.permute.xlu1 %v2864_v0  ;;  %v3036_v25 = vld [vmem:[%s4114_s0 + $0x1d0] sm:$0xff]  ;;  %v3161_v54 = vld [vmem:[%s4114_s0 + $0x148] sm:$0xff] }
  0x10   :  { %563 = vperm.xlu1 %2800, %v29_v6   ;;  %v1004_v27 = vld [vmem:[%s4115_s3 + $0x10] sm:$0xff]  ;;  %v3175_v58 = vld [vmem:[%s4114_s0 + $0x168] sm:$0xff] }
  0x11   :  { %2595 = vmatprep.subr.msk.mxu0 %vm1013_vm0, %v1004_v27 }
  0x12   :  { %623 = vperm.xlu0 %2799, %v2952_v9   ;;  %2596 = vmatpush3.xpose.msk.msra.mxu0 %vm1013_vm0, %v1004_v27 }
  0x13   :  { %2597 = vmatprep.subr.msk.mxu0 %vm1013_vm0, %v1003_v28 }
  0x14   :  { %2801 = vset.pattern.permute.xlu1 %v2865_v7 }
  0x15   :  { %114 = vperm.xlu1 %2801, %v30_v10  }
  0x16   :  { %639 = vperm.xlu0 %2799, %v2961_v11   ;;  %2598 = vmatpush3.xpose.msk.msra.mxu0 %vm1013_vm0, %v1003_v28  ;;  %v58_v28 = vld [vmem:[%s4114_s0 + $0x100] sm:$0xff] }
  0x17   :  { %2599 = vmatprep.subr.msk.mxu0 %vm1013_vm0, %v1002_v30 }
  0x19   :  { %2802 = vset.pattern.permute.xlu1 %v2864_v0 }
  0x1a   :  { %655 = vperm.xlu0 %2799, %v2968_v12   ;;  %567 = vperm.xlu1 %2802, %v30_v10   ;;  %v412_v10 = vlaneseq }
  0x1b   :  { %2600 = vmatpush3.xpose.msk.msra.mxu0 %vm1013_vm0, %v1002_v30  ;;  %v3268_v30 = vld [vmem:[%s4117_s2] ss:$0 sm:$0xff] }
  0x1e   :  { %671 = vperm.xlu0 %2799, %v2975_v13   ;;  %571 = vperm.xlu1 %2802, %v31_v14  }
  0x22   :  { %687 = vperm.xlu0 %2799, %v2984_v15   ;;  %2803 = vset.pattern.permute.xlu1 %v2865_v7 }
  0x23   :  { %129 = vperm.xlu1 %2803, %v33_v16  }
  0x26   :  { %703 = vperm.xlu0 %2799, %v2994_v17  }
  0x27   :  { %2804 = vset.pattern.permute.xlu1 %v2864_v0 }
  0x28   :  { %579 = vperm.xlu1 %2804, %v33_v16  }
  0x2a   :  { %719 = vperm.xlu0 %2799, %v3001_v18  }
  0x2c   :  { %2805 = vset.pattern.permute.xlu1 %v2865_v7 }
  0x2d   :  { %134 = vperm.xlu1 %2805, %v34_v19  }
  0x2e   :  { %735 = vperm.xlu0 %2799, %v3010_v20  }
  0x31   :  { %2806 = vset.pattern.permute.xlu1 %v2864_v0 }
  0x32   :  { %751 = vperm.xlu0 %2799, %v3017_v21   ;;  %583 = vperm.xlu1 %2806, %v34_v19  }
  0x36   :  { %767 = vperm.xlu0 %2799, %v3024_v22   ;;  %587 = vperm.xlu1 %2806, %v35_v23  }
  0x3a   :  { %783 = vperm.xlu0 %2799, %v3036_v25   ;;  %2807 = vset.pattern.permute.xlu1 %v2865_v7 }
  0x3b   :  { %149 = vperm.xlu1 %2807, %v37_v26  }
  0x3e   :  { %2856 = vset.pattern.permute.xlu0 %v2865_v7 }
  0x3f   :  { %94 = vperm.xlu0 %2856, %v2916_v2   ;;  %2808 = vset.pattern.permute.xlu1 %v2864_v0 }
  0x40   :  { %595 = vperm.xlu1 %2808, %v37_v26  }
  0x43   :  { %99 = vperm.xlu0 %2856, %v2928_v4  }
  0x44   :  { %2809 = vset.pattern.permute.xlu1 %v2865_v7 }
  0x45   :  { %154 = vperm.xlu1 %2809, %v38_v29  }
  0x47   :  { %104 = vperm.xlu0 %2856, %v2911_v1   ;;  %v3195_v1 = vld [vmem:[%s4114_s0 + $0x188] sm:$0xff] }
  0x49   :  { %2810 = vset.pattern.permute.xlu1 %v2864_v0 }
  0x4a   :  { %599 = vperm.xlu1 %2810, %v38_v29  }
  0x4b   :  { %119 = vperm.xlu0 %2856, %v31_v14   ;;  %v57_v14 = vld [vmem:[%s4114_s0 + $0xf8] sm:$0xff] }
  0x4e   :  { %603 = vperm.xlu1 %2810, %v39_v31  }
  0x4f   :  { %124 = vperm.xlu0 %2856, %v2923_v3   ;;  %v54_v3 = vld [vmem:[%s4114_s0 + $0xe0] sm:$0xff] }
  0x52   :  { %2811 = vset.pattern.permute.xlu1 %v2865_v7 }
  0x53   :  { %139 = vperm.xlu0 %2856, %v35_v23   ;;  %169 = vperm.xlu1 %2811, %v41_v32   ;;  %v3252_v23 = vld [vmem:[%s4114_s0 + $0x1e8] sm:$0xff] }
  0x57   :  { %144 = vperm.xlu0 %2856, %v2935_v5   ;;  %2812 = vset.pattern.permute.xlu1 %v2864_v0 }
  0x58   :  { %611 = vperm.xlu1 %2812, %v41_v32  }
  0x5b   :  { %159 = vperm.xlu0 %2856, %v39_v31   ;;  %v88_v31 = vld [vmem:[%s4114_s0 + $0x1f0] sm:$0xff] }
  0x5c   :  { %2813 = vset.pattern.permute.xlu1 %v2865_v7 }
  0x5d   :  { %174 = vperm.xlu1 %2813, %v42_v33  }
  0x5f   :  { %164 = vperm.xlu0 %2856, %v2945_v8   ;;  %v3214_v8 = vld [vmem:[%s4114_s0 + $0x1a8] sm:$0xff] }
  0x61   :  { %2814 = vset.pattern.permute.xlu1 %v2864_v0 }
  0x62   :  { %615 = vperm.xlu1 %2814, %v42_v33  }
  0x63   :  { %179 = vperm.xlu0 %2856, %v43_v34  }
  0x66   :  { %619 = vperm.xlu1 %2814, %v43_v34  }
  0x67   :  { %184 = vperm.xlu0 %2856, %v2952_v9  }
  0x6a   :  { %2815 = vset.pattern.permute.xlu1 %v2865_v7 }
  0x6b   :  { %199 = vperm.xlu0 %2856, %v47_v35   ;;  %189 = vperm.xlu1 %2815, %v45_v36  }
  0x6f   :  { %204 = vperm.xlu0 %2856, %v2961_v11   ;;  %2816 = vset.pattern.permute.xlu1 %v2864_v0 }
  0x70   :  { %627 = vperm.xlu1 %2816, %v45_v36  }
  0x73   :  { %219 = vperm.xlu0 %2856, %v51_v37  }
  0x74   :  { %2817 = vset.pattern.permute.xlu1 %v2865_v7 }
  0x75   :  { %194 = vperm.xlu1 %2817, %v46_v38  }
  0x77   :  { %224 = vperm.xlu0 %2856, %v2968_v12  }
  0x79   :  { %2818 = vset.pattern.permute.xlu1 %v2864_v0 }
  0x7a   :  { %631 = vperm.xlu1 %2818, %v46_v38  }
  0x7b   :  { %239 = vperm.xlu0 %2856, %v3110_v39  }
  0x7d   :  { %v3114_v40 = vpop.permute.xlu1 %551  ;;  %v3116_v41 = vpop.permute.xlu0 %559 }
  0x7e   :  { %635 = vperm.xlu1 %2818, %v47_v35  }
  0x7f   :  { %244 = vperm.xlu0 %2856, %v2975_v13   ;;  %v3229_v13 = vld [vmem:[%s4114_s0 + $0x1c8] sm:$0xff] }
  0x81   :  { %v3127_v44 = vpop.permute.xlu1 %555  ;;  %v3129_v45 = vpop.permute.xlu0 %575 }
  0x82   :  { %2819 = vset.pattern.permute.xlu1 %v2865_v7 }
  0x83   :  { %259 = vperm.xlu0 %2856, %v3122_v42   ;;  %209 = vperm.xlu1 %2819, %v49_v43  }
  0x85   :  { %v3133_v46 = vpop.permute.xlu0 %591 }
  0x86   :  { %v3135_v47 = vpop.permute.xlu1 %109 }
  0x87   :  { %264 = vperm.xlu0 %2856, %v2984_v15   ;;  %2820 = vset.pattern.permute.xlu1 %v2864_v0  ;;  %v413_v15 = vshrl.u32 %v412_v10, 7 }
  0x88   :  { %643 = vperm.xlu1 %2820, %v49_v43  }
  0x89   :  { %v3144_v49 = vpop.permute.xlu0 %607  ;;  %v414_v19 = vsub.s32 0, %v413_v15 }
  0x8b   :  { %279 = vperm.xlu0 %2856, %v3142_v48   ;;  %v3150_v51 = vpop.permute.xlu1 %563 }
  0x8c   :  { %2821 = vset.pattern.permute.xlu1 %v2865_v7 }
  0x8d   :  { %214 = vperm.xlu1 %2821, %v50_v50   ;;  %v3153_v52 = vpop.permute.xlu0 %623 }
  0x8f   :  { %284 = vperm.xlu0 %2856, %v2994_v17  }
  0x90   :  { %v3156_v53 = vpop.permute.xlu1 %114 }
  0x91   :  { %2822 = vset.pattern.permute.xlu1 %v2864_v0  ;;  %v3164_v55 = vpop.permute.xlu0 %639 }
  0x92   :  { %647 = vperm.xlu1 %2822, %v50_v50  }
  0x93   :  { %299 = vperm.xlu0 %2856, %v3161_v54  }
  0x95   :  { %v3167_v56 = vpop.permute.xlu1 %567  ;;  %v3169_v57 = vpop.permute.xlu0 %655 }
  0x96   :  { %651 = vperm.xlu1 %2822, %v51_v37  }
  0x97   :  { %304 = vperm.xlu0 %2856, %v3001_v18   ;;  %v808_v18 = vsub.s32 1, %v413_v15 }
  0x99   :  { %v3180_v60 = vpop.permute.xlu1 %571  ;;  %v3182_v61 = vpop.permute.xlu0 %671 }
  0x9a   :  { %2823 = vset.pattern.permute.xlu1 %v2865_v7 }
  0x9b   :  { %319 = vperm.xlu0 %2856, %v3175_v58   ;;  %229 = vperm.xlu1 %2823, %v53_v59  }
  0x9d   :  { %v3186_v62 = vpop.permute.xlu0 %687 }
  0x9e   :  { %v3188_v63 = vpop.permute.xlu1 %129 }
  0x9f   :  { %324 = vperm.xlu0 %2856, %v3010_v20   ;;  %2824 = vset.pattern.permute.xlu1 %v2864_v0 }
  0xa0   :  { %659 = vperm.xlu1 %2824, %v53_v59  }
  0xa1   :  { %v3197_v2 = vpop.permute.xlu0 %703 }
  0xa3   :  { %339 = vperm.xlu0 %2856, %v3195_v1   ;;  %v3203_v4 = vpop.permute.xlu1 %579 }
  0xa4   :  { %2825 = vset.pattern.permute.xlu1 %v2865_v7 }
  0xa5   :  { %234 = vperm.xlu1 %2825, %v54_v3   ;;  %v3206_v5 = vpop.permute.xlu0 %719 }
  0xa7   :  { %344 = vperm.xlu0 %2856, %v3017_v21   ;;  %v90_v21 = vld [vmem:[%s4116_s1] sm:$0x3] }
  0xa8   :  { %v3209_v6 = vpop.permute.xlu1 %134  ;;  %v3254_v24 = vrot.slane %v90_v21, %v808_v18  ;;  %v3256_v26 = vrot.slane %v90_v21, %v414_v19 }
  0xa9   :  { %2826 = vset.pattern.permute.xlu1 %v2864_v0  ;;  %v3217_v9 = vpop.permute.xlu0 %735 }
  0xaa   :  { %663 = vperm.xlu1 %2826, %v54_v3   ;;  %v810_v32 = vmul.f32 %v3254_v24, %v3114_v40  ;;  %v419_v37 = vmul.f32 %v3256_v26, %v3135_v47  ;;  %v420_v43 = vmul.f32 %v3256_v26, %v3156_v53  ;;  %v812_v59 = vmul.f32 %v3254_v24, %v3116_v41 }
  0xab   :  { %359 = vperm.xlu0 %2856, %v3214_v8   ;;  %v813_v3 = vmul.f32 %v3254_v24, %v3150_v51  ;;  %v814_v10 = vmul.f32 %v3254_v24, %v3167_v56 }
  0xac   :  { %v489_v53 = vadd.f32 %v3268_v30, %v419_v37  ;;  %v490_v41 = vadd.f32 %v3268_v30, %v420_v43 }
  0xad   :  { %v3220_v11 = vpop.permute.xlu1 %583  ;;  %v3222_v12 = vpop.permute.xlu0 %751 }
  0xae   :  { %667 = vperm.xlu1 %2826, %v3110_v39   ;;  %v811_v39 = vmul.f32 %v3254_v24, %v3127_v44  ;;  %v877_v19 = vadd.f32 %v813_v3, %v489_v53  ;;  %v878_v56 = vadd.f32 %v814_v10, %v490_v41 }
  0xaf   :  { %364 = vperm.xlu0 %2856, %v3024_v22  }
  0xb0   :  { %v941_v37 = vmax.f32 %v877_v19, 0.0  ;;  %v942_v43 = vmax.f32 %v878_v56, 0.0 }
  0xb1   :  { %v3234_v16 = vpop.permute.xlu1 %587  ;;  %v3236_v17 = vpop.permute.xlu0 %767 }
  0xb2   :  { %2827 = vset.pattern.permute.xlu1 %v2865_v7  ;;  %v819_v41 = vmul.f32 %v3254_v24, %v3234_v16 }
  0xb3   :  { %379 = vperm.xlu0 %2856, %v3229_v13   ;;  %249 = vperm.xlu1 %2827, %v57_v14  }
  0xb5   :  { %v3240_v20 = vpop.permute.xlu0 %783 }
  0xb6   :  { %v3245_v22 = vpop.permute.xlu1 %149 }
  0xb7   :  { %384 = vperm.xlu0 %2856, %v3036_v25   ;;  %2828 = vset.pattern.permute.xlu1 %v2864_v0  ;;  %v427_v53 = vmul.f32 %v3256_v26, %v3245_v22 }
  0xb8   :  { %675 = vperm.xlu1 %2828, %v57_v14  }
  0xba   :  { %v95_v27 = vpop.permute.xlu0 %94 }
  0xbb   :  { %v416_v29 = vmul.f32 %v3256_v26, %v95_v27  ;;  %v3262_v25 = vpop.permute.xlu1 %595  ;;  %399 = vperm.xlu0 %2856, %v3252_v23  }
  0xbc   :  { %2829 = vset.pattern.permute.xlu1 %v2865_v7 }
  0xbd   :  { %v486_v33 = vadd.f32 %v3268_v30, %v416_v29  ;;  %254 = vperm.xlu1 %2829, %v58_v28   ;;  %v423_v29 = vmul.f32 %v3256_v26, %v3188_v63  ;;  %v817_v63 = vmul.f32 %v3254_v24, %v3203_v4 }
  0xbe   :  { %v100_v34 = vpop.permute.xlu0 %99 }
  0xbf   :  { %v417_v35 = vmul.f32 %v3256_v26, %v100_v34  ;;  %v874_v36 = vadd.f32 %v810_v32, %v486_v33  ;;  %404 = vperm.xlu0 %2856, %v88_v31   ;;  %v815_v32 = vmul.f32 %v3254_v24, %v3180_v60  ;;  %v424_v33 = vmul.f32 %v3256_v26, %v3209_v6 }
  0xc0   :  { %v3280_v38 = vpop.permute.xlu1 %154  ;;  %v818_v60 = vmul.f32 %v3254_v24, %v3220_v11 }
  0xc1   :  { %v487_v40 = vadd.f32 %v3268_v30, %v417_v35  ;;  %2830 = vset.pattern.permute.xlu1 %v2864_v0  ;;  %v938_v50 = vmax.f32 %v874_v36, 0.0  ;;  %v816_v36 = vmul.f32 %v3254_v24, %v3129_v45  ;;  %v494_v45 = vadd.f32 %v3268_v30, %v424_v33 }
  0xc2   :  { %v105_v47 = vpop.permute.xlu0 %104  ;;  %679 = vperm.xlu1 %2830, %v58_v28  }
  0xc3   :  { %v875_v44 = vadd.f32 %v811_v39, %v487_v40  ;;  %v418_v14 = vmul.f32 %v3256_v26, %v105_v47  ;;  %2601 = vmatprep.mubr.msk.f32.mxu0 %vm1013_vm0, %v938_v50  ;;  %2861 = vset.pattern.permute.xlu0 %v2864_v0  ;;  %v493_v50 = vadd.f32 %v3268_v30, %v423_v29 }
  0xc4   :  { %799 = vperm.xlu0 %2861, %v88_v31   ;;  %v61_v31 = vld [vmem:[%s4114_s0 + $0x118] sm:$0xff]  ;;  %v882_v10 = vadd.f32 %v818_v60, %v494_v45 }
  0xc5   :  { %v939_v15 = vmax.f32 %v875_v44, 0.0  ;;  %v488_v51 = vadd.f32 %v3268_v30, %v418_v14  ;;  %v600_v18 = vpop.permute.xlu1 %599  ;;  %v881_v3 = vadd.f32 %v817_v63, %v493_v50 }
  0xc6   :  { %v120_v21 = vpop.permute.xlu0 %119  ;;  %683 = vperm.xlu1 %2830, %v3122_v42   ;;  %v946_v29 = vmax.f32 %v882_v10, 0.0  ;;  %v822_v16 = vmul.f32 %v3254_v24, %v600_v18 }
  0xc7   :  { %v876_v27 = vadd.f32 %v812_v59, %v488_v51  ;;  %v421_v28 = vmul.f32 %v3256_v26, %v120_v21  ;;  %2602 = vmatmul.mubr.msk.f32.vlgmr.msra.gmra.mxu0 %vm1013_vm0, %v939_v15  ;;  %v428_v15 = vmul.f32 %v3256_v26, %v3280_v38  ;;  %v820_v21 = vmul.f32 %v3254_v24, %v3133_v46 }
  0xc8   :  { %v945_v56 = vmax.f32 %v881_v3, 0.0  ;;  %v497_v46 = vadd.f32 %v3268_v30, %v427_v53  ;;  %v824_v3 = vmul.f32 %v3254_v24, %v3144_v49 }
  0xc9   :  { %v940_v42 = vmax.f32 %v876_v27, 0.0  ;;  %v491_v34 = vadd.f32 %v3268_v30, %v421_v28  ;;  %v604_v35 = vpop.permute.xlu1 %603  ;;  %v821_v27 = vmul.f32 %v3254_v24, %v3262_v25  ;;  %v62_v28 = vld [vmem:[%s4114_s0 + $0x120] sm:$0xff]  ;;  %v498_v25 = vadd.f32 %v3268_v30, %v428_v15 }
  0xca   :  { %v125_v39 = vpop.permute.xlu0 %124  ;;  %2831 = vset.pattern.permute.xlu1 %v2865_v7  ;;  %v823_v60 = vmul.f32 %v3254_v24, %v604_v35 }
  0xcb   :  { %v879_v40 = vadd.f32 %v815_v32, %v491_v34  ;;  %v422_v6 = vmul.f32 %v3256_v26, %v125_v39  ;;  %269 = vperm.xlu1 %2831, %v61_v31   ;;  %2604 = vmatprep.mubr.msk.f32.mxu0 %vm1013_vm0, %v940_v42  ;;  %v885_v18 = vadd.f32 %v821_v27, %v497_v46  ;;  %v65_v27 = vld [vmem:[%s4114_s0 + $0x138] sm:$0xff] }
  0xcc   :  { %2605 = vmatmul.mubr.msk.f32.gmra.mxu0 %vm1013_vm0, %v941_v37 }
  0xcd   :  { %v943_v4 = vmax.f32 %v879_v40, 0.0  ;;  %v492_v59 = vadd.f32 %v3268_v30, %v422_v6  ;;  %2607 = vmatprep.mubr.msk.f32.mxu0 %vm1013_vm0, %v942_v43  ;;  %v949_v50 = vmax.f32 %v885_v18, 0.0 }
  0xce   :  { %v140_v47 = vpop.permute.xlu0 %139  ;;  %v170_v11 = vpop.permute.xlu1 %169 }
  0xcf   :  { %v880_v44 = vadd.f32 %v816_v36, %v492_v59  ;;  %v425_v14 = vmul.f32 %v3256_v26, %v140_v47  ;;  %2832 = vset.pattern.permute.xlu1 %v2864_v0  ;;  %v886_v36 = vadd.f32 %v822_v16, %v498_v25  ;;  %v431_v39 = vmul.f32 %v3256_v26, %v170_v11 }
  0xd0   :  { %691 = vperm.xlu1 %2832, %v61_v31   ;;  %2608 = vmatmul.mubr.msk.f32.gmra.mxu0 %vm1013_vm0, %v943_v4 }
  0xd1   :  { %v944_v51 = vmax.f32 %v880_v44, 0.0  ;;  %v495_v19 = vadd.f32 %v3268_v30, %v425_v14  ;;  %v950_v47 = vmax.f32 %v886_v36, 0.0  ;;  %v501_v35 = vadd.f32 %v3268_v30, %v431_v39 }
  0xd2   :  { %v145_v22 = vpop.permute.xlu0 %144 }
  0xd3   :  { %v883_v31 = vadd.f32 %v819_v41, %v495_v19  ;;  %v426_v38 = vmul.f32 %v3256_v26, %v145_v22  ;;  %2610 = vmatprep.mubr.msk.f32.mxu0 %vm1013_vm0, %v944_v51  ;;  %v612_v32 = vpop.permute.xlu1 %611 }
  0xd4   :  { %2833 = vset.pattern.permute.xlu1 %v2865_v7  ;;  %2611 = vmatmul.mubr.msk.f32.gmra.mxu0 %vm1013_vm0, %v945_v56  ;;  %v825_v45 = vmul.f32 %v3254_v24, %v612_v32 }
  0xd5   :  { %v947_v33 = vmax.f32 %v883_v31, 0.0  ;;  %v496_v42 = vadd.f32 %v3268_v30, %v426_v38  ;;  %274 = vperm.xlu1 %2833, %v62_v28   ;;  %2613 = vmatprep.mubr.msk.f32.mxu0 %vm1013_vm0, %v946_v29 }
  0xd6   :  { %v160_v34 = vpop.permute.xlu0 %159  ;;  %v889_v41 = vadd.f32 %v825_v45, %v501_v35 }
  0xd7   :  { %v884_v37 = vadd.f32 %v820_v21, %v496_v42  ;;  %v429_v63 = vmul.f32 %v3256_v26, %v160_v34 }
  0xd8   :  { %2614 = vmatmul.mubr.msk.f32.gmra.mxu0 %vm1013_vm0, %v947_v33  ;;  %v175_v43 = vpop.permute.xlu1 %174  ;;  %v953_v16 = vmax.f32 %v889_v41, 0.0  ;;  %v69_v41 = vld [vmem:[%s4114_s0 + $0x158] sm:$0xff] }
  0xd9   :  { %v948_v40 = vmax.f32 %v884_v37, 0.0  ;;  %v499_v6 = vadd.f32 %v3268_v30, %v429_v63  ;;  %2834 = vset.pattern.permute.xlu1 %v2864_v0  ;;  %v432_v4 = vmul.f32 %v3256_v26, %v175_v43  ;;  %v66_v63 = vld [vmem:[%s4114_s0 + $0x140] sm:$0xff] }
  0xda   :  { %v165_v59 = vpop.permute.xlu0 %164  ;;  %695 = vperm.xlu1 %2834, %v62_v28  }
  0xdb   :  { %v887_v11 = vadd.f32 %v823_v60, %v499_v6  ;;  %v430_v10 = vmul.f32 %v3256_v26, %v165_v59  ;;  %2616 = vmatprep.mubr.msk.f32.mxu0 %vm1013_vm0, %v948_v40  ;;  %v502_v15 = vadd.f32 %v3268_v30, %v432_v4 }
  0xdc   :  { %2617 = vmatmul.mubr.msk.f32.gmra.mxu0 %vm1013_vm0, %v949_v50 }
  0xdd   :  { %v951_v44 = vmax.f32 %v887_v11, 0.0  ;;  %v500_v14 = vadd.f32 %v3268_v30, %v430_v10  ;;  %2619 = vmatprep.mubr.msk.f32.mxu0 %vm1013_vm0, %v950_v47  ;;  %v616_v53 = vpop.permute.xlu1 %615  ;;  %v832_v47 = vmul.f32 %v3254_v24, %v3164_v55 }
  0xde   :  { %v826_v49 = vmul.f32 %v3254_v24, %v616_v53  ;;  %v180_v51 = vpop.permute.xlu0 %179  ;;  %699 = vperm.xlu1 %2834, %v3142_v48   ;;  %v828_v48 = vmul.f32 %v3254_v24, %v3153_v52 }
  0xdf   :  { %v888_v19 = vadd.f32 %v824_v3, %v500_v14  ;;  %v433_v21 = vmul.f32 %v3256_v26, %v180_v51 }
  0xe0   :  { %v890_v56 = vadd.f32 %v826_v49, %v502_v15  ;;  %2620 = vmatmul.mubr.msk.f32.gmra.mxu0 %vm1013_vm0, %v951_v44 }
  0xe1   :  { %v952_v22 = vmax.f32 %v888_v19, 0.0  ;;  %v503_v28 = vadd.f32 %v3268_v30, %v433_v21  ;;  %v620_v29 = vpop.permute.xlu1 %619 }
  0xe2   :  { %v954_v31 = vmax.f32 %v890_v56, 0.0  ;;  %v827_v38 = vmul.f32 %v3254_v24, %v620_v29  ;;  %v185_v32 = vpop.permute.xlu0 %184  ;;  %2835 = vset.pattern.permute.xlu1 %v2865_v7 }
  0xe3   :  { %v434_v46 = vmul.f32 %v3256_v26, %v185_v32  ;;  %289 = vperm.xlu1 %2835, %v65_v27   ;;  %2622 = vmatprep.mubr.msk.f32.mxu0 %vm1013_vm0, %v952_v22 }
  0xe4   :  { %v891_v25 = vadd.f32 %v827_v38, %v503_v28  ;;  %2623 = vmatmul.mubr.msk.f32.gmra.mxu0 %vm1013_vm0, %v953_v16  ;;  %v70_v28 = vld [vmem:[%s4114_s0 + $0x160] sm:$0xff] }
  0xe5   :  { %v504_v33 = vadd.f32 %v3268_v30, %v434_v46  ;;  %2625 = vmatprep.mubr.msk.f32.mxu0 %vm1013_vm0, %v954_v31 }
  0xe6   :  { %v955_v42 = vmax.f32 %v891_v25, 0.0  ;;  %v190_v18 = vpop.permute.xlu1 %189  ;;  %v200_v37 = vpop.permute.xlu0 %199 }
  0xe7   :  { %v892_v34 = vadd.f32 %v828_v48, %v504_v33  ;;  %2836 = vset.pattern.permute.xlu1 %v2864_v0  ;;  %v435_v36 = vmul.f32 %v3256_v26, %v190_v18  ;;  %v437_v3 = vmul.f32 %v3256_v26, %v200_v37 }
  0xe8   :  { %707 = vperm.xlu1 %2836, %v65_v27   ;;  %2626 = vmatmul.mubr.msk.f32.gmra.mxu0 %vm1013_vm0, %v955_v42  ;;  %v1667_v42 = vld [vmem:[%s4118_s5] sm:$0x3] }
  0xe9   :  { %v956_v52 = vmax.f32 %v892_v34, 0.0  ;;  %v505_v43 = vadd.f32 %v3268_v30, %v435_v36  ;;  %v507_v14 = vadd.f32 %v3268_v30, %v437_v3  ;;  %2697 = vmatprep.subr.msk.mxu1 %vm1013_vm0, %v1667_v42  ;;  %v836_v34 = vmul.f32 %v3254_v24, %v3169_v57 }
  0xea   :  { %v205_v6 = vpop.permute.xlu0 %204  ;;  %2698 = vmatpush3.xpose.msk.msra.mxu1 %vm1013_vm0, %v1667_v42 }
  0xeb   :  { %v628_v39 = vpop.permute.xlu1 %627  ;;  %2628 = vmatprep.mubr.msk.f32.mxu0 %vm1013_vm0, %v956_v52  ;;  %v438_v4 = vmul.f32 %v3256_v26, %v205_v6 }
  0xec   :  { %v829_v60 = vmul.f32 %v3254_v24, %v628_v39  ;;  %2837 = vset.pattern.permute.xlu1 %v2865_v7 }
  0xed   :  { %294 = vperm.xlu1 %2837, %v66_v63   ;;  %v508_v11 = vadd.f32 %v3268_v30, %v438_v4 }
  0xee   :  { %v893_v40 = vadd.f32 %v829_v60, %v505_v43  ;;  %v220_v22 = vpop.permute.xlu0 %219  ;;  %v73_v60 = vld [vmem:[%s4114_s0 + $0x178] sm:$0xff] }
  0xef   :  { %v896_v15 = vadd.f32 %v832_v47, %v508_v11  ;;  %v441_v18 = vmul.f32 %v3256_v26, %v220_v22  ;;  %v74_v11 = vld [vmem:[%s4114_s0 + $0x180] sm:$0xff] }
  0xf0   :  { %v957_v50 = vmax.f32 %v893_v40, 0.0  ;;  %v195_v45 = vpop.permute.xlu1 %194 }
  0xf1   :  { %2838 = vset.pattern.permute.xlu1 %v2864_v0  ;;  %v436_v59 = vmul.f32 %v3256_v26, %v195_v45  ;;  %v960_v21 = vmax.f32 %v896_v15, 0.0  ;;  %v511_v39 = vadd.f32 %v3268_v30, %v441_v18 }
  0xf2   :  { %711 = vperm.xlu1 %2838, %v66_v63   ;;  %2629 = vmatmul.mubr.msk.f32.gmra.mxu0 %vm1013_vm0, %v957_v50  ;;  %v225_v32 = vpop.permute.xlu0 %224 }
  0xf3   :  { %v506_v35 = vadd.f32 %v3268_v30, %v436_v59  ;;  %v442_v25 = vmul.f32 %v3256_v26, %v225_v32 }
  0xf5   :  { %v632_v10 = vpop.permute.xlu1 %631  ;;  %v512_v36 = vadd.f32 %v3268_v30, %v442_v25 }
  0xf6   :  { %v830_v44 = vmul.f32 %v3254_v24, %v632_v10  ;;  %715 = vperm.xlu1 %2838, %v3161_v54   ;;  %v240_v47 = vpop.permute.xlu0 %239 }
  0xf7   :  { %v900_v40 = vadd.f32 %v836_v34, %v512_v36 }
  0xf8   :  { %v894_v53 = vadd.f32 %v830_v44, %v506_v35 }
  0xf9   :  { %v636_v49 = vpop.permute.xlu1 %635  ;;  %v964_v4 = vmax.f32 %v900_v40, 0.0 }
  0xfa   :  { %v958_v51 = vmax.f32 %v894_v53, 0.0  ;;  %v831_v55 = vmul.f32 %v3254_v24, %v636_v49  ;;  %2839 = vset.pattern.permute.xlu1 %v2865_v7  ;;  %v245_v53 = vpop.permute.xlu0 %244 }
  0xfb   :  { %309 = vperm.xlu1 %2839, %v69_v41   ;;  %v446_v49 = vmul.f32 %v3256_v26, %v245_v53 }
  0xfc   :  { %v895_v19 = vadd.f32 %v831_v55, %v507_v14  ;;  %2631 = vmatprep.mubr.msk.f32.mxu0 %vm1013_vm0, %v958_v51  ;;  %v445_v55 = vmul.f32 %v3256_v26, %v240_v47 }
  0xfe   :  { %v959_v54 = vmax.f32 %v895_v19, 0.0  ;;  %v210_v56 = vpop.permute.xlu1 %209  ;;  %v840_v19 = vmul.f32 %v3254_v24, %v3182_v61  ;;  %v515_v22 = vadd.f32 %v3268_v30, %v445_v55  ;;  %v260_v18 = vpop.permute.xlu0 %259 }
  0xff   :  { %2840 = vset.pattern.permute.xlu1 %v2864_v0  ;;  %v439_v27 = vmul.f32 %v3256_v26, %v210_v56  ;;  %v449_v40 = vmul.f32 %v3256_v26, %v260_v18 }
 0x100   :  { %723 = vperm.xlu1 %2840, %v69_v41   ;;  %2632 = vmatmul.mubr.msk.f32.gmra.mxu0 %vm1013_vm0, %v959_v54 }
 0x101   :  { %2634 = vmatprep.mubr.msk.f32.mxu0 %vm1013_vm0, %v960_v21  ;;  %v509_v16 = vadd.f32 %v3268_v30, %v439_v27  ;;  %v516_v21 = vadd.f32 %v3268_v30, %v446_v49 }
 0x103   :  { %v644_v29 = vpop.permute.xlu1 %643 }
 0x104   :  { %v833_v31 = vmul.f32 %v3254_v24, %v644_v29  ;;  %2841 = vset.pattern.permute.xlu1 %v2865_v7  ;;  %v77_v29 = vld [vmem:[%s4114_s0 + $0x198] sm:$0xff] }
 0x105   :  { %314 = vperm.xlu1 %2841, %v70_v28  }
 0x106   :  { %v897_v38 = vadd.f32 %v833_v31, %v509_v16  ;;  %v904_v16 = vadd.f32 %v840_v19, %v516_v21 }
 0x108   :  { %v961_v48 = vmax.f32 %v897_v38, 0.0  ;;  %v215_v46 = vpop.permute.xlu1 %214 }
 0x109   :  { %2842 = vset.pattern.permute.xlu1 %v2864_v0  ;;  %v440_v33 = vmul.f32 %v3256_v26, %v215_v46 }
 0x10a   :  { %727 = vperm.xlu1 %2842, %v70_v28   ;;  %2635 = vmatmul.mubr.msk.f32.gmra.mxu0 %vm1013_vm0, %v961_v48  ;;  %v968_v48 = vmax.f32 %v904_v16, 0.0 }
 0x10b   :  { %v510_v37 = vadd.f32 %v3268_v30, %v440_v33  ;;  %v78_v33 = vld [vmem:[%s4114_s0 + $0x1a0] sm:$0xff] }
 0x10d   :  { %v648_v52 = vpop.permute.xlu1 %647 }
 0x10e   :  { %v834_v63 = vmul.f32 %v3254_v24, %v648_v52  ;;  %731 = vperm.xlu1 %2842, %v3175_v58  }
 0x110   :  { %v898_v43 = vadd.f32 %v834_v63, %v510_v37 }
 0x111   :  { %v652_v6 = vpop.permute.xlu1 %651 }
 0x112   :  { %v962_v50 = vmax.f32 %v898_v43, 0.0  ;;  %v835_v57 = vmul.f32 %v3254_v24, %v652_v6  ;;  %2843 = vset.pattern.permute.xlu1 %v2865_v7 }
 0x113   :  { %329 = vperm.xlu1 %2843, %v73_v60  }
 0x114   :  { %v899_v45 = vadd.f32 %v835_v57, %v511_v39  ;;  %2637 = vmatprep.mubr.msk.f32.mxu0 %vm1013_vm0, %v962_v50  ;;  %v265_v39 = vpop.permute.xlu0 %264 }
 0x116   :  { %v963_v58 = vmax.f32 %v899_v45, 0.0  ;;  %v230_v59 = vpop.permute.xlu1 %229  ;;  %v844_v45 = vmul.f32 %v3254_v24, %v3186_v62 }
 0x117   :  { %2844 = vset.pattern.permute.xlu1 %v2864_v0  ;;  %v443_v3 = vmul.f32 %v3256_v26, %v230_v59 }
 0x118   :  { %739 = vperm.xlu1 %2844, %v73_v60   ;;  %2638 = vmatmul.mubr.msk.f32.gmra.mxu0 %vm1013_vm0, %v963_v58  ;;  %v450_v60 = vmul.f32 %v3256_v26, %v265_v39  ;;  %v519_v58 = vadd.f32 %v3268_v30, %v449_v40  ;;  %v280_v49 = vpop.permute.xlu0 %279 }
 0x119   :  { %2640 = vmatprep.mubr.msk.f32.mxu0 %vm1013_vm0, %v964_v4  ;;  %v513_v35 = vadd.f32 %v3268_v30, %v443_v3  ;;  %v81_v3 = vld [vmem:[%s4114_s0 + $0x1b8] sm:$0xff] }
 0x11a   :  { %v520_v4 = vadd.f32 %v3268_v30, %v450_v60 }
 0x11b   :  { %v660_v10 = vpop.permute.xlu1 %659 }
 0x11c   :  { %v837_v44 = vmul.f32 %v3254_v24, %v660_v10  ;;  %2845 = vset.pattern.permute.xlu1 %v2865_v7 }
 0x11d   :  { %334 = vperm.xlu1 %2845, %v74_v11  }
 0x11e   :  { %v901_v14 = vadd.f32 %v837_v44, %v513_v35  ;;  %v908_v35 = vadd.f32 %v844_v45, %v520_v4 }
 0x120   :  { %v965_v41 = vmax.f32 %v901_v14, 0.0  ;;  %v235_v15 = vpop.permute.xlu1 %234  ;;  %v972_v14 = vmax.f32 %v908_v35, 0.0  ;;  %v89_v35 = vld [vmem:[%s4114_s0 + $0x1f8] sm:$0xff] }
 0x121   :  { %2846 = vset.pattern.permute.xlu1 %v2864_v0  ;;  %v444_v51 = vmul.f32 %v3256_v26, %v235_v15 }
 0x122   :  { %743 = vperm.xlu1 %2846, %v74_v11   ;;  %2641 = vmatmul.mubr.msk.f32.gmra.mxu0 %vm1013_vm0, %v965_v41  ;;  %v82_v41 = vld [vmem:[%s4114_s0 + $0x1c0] sm:$0xff] }
 0x123   :  { %v514_v56 = vadd.f32 %v3268_v30, %v444_v51 }
 0x125   :  { %v664_v54 = vpop.permute.xlu1 %663 }
 0x126   :  { %v838_v27 = vmul.f32 %v3254_v24, %v664_v54  ;;  %747 = vperm.xlu1 %2846, %v3195_v1  }
 0x128   :  { %v902_v28 = vadd.f32 %v838_v27, %v514_v56  ;;  %v285_v56 = vpop.permute.xlu0 %284 }
 0x129   :  { %v668_v31 = vpop.permute.xlu1 %667 }
 0x12a   :  { %v966_v38 = vmax.f32 %v902_v28, 0.0  ;;  %v839_v61 = vmul.f32 %v3254_v24, %v668_v31  ;;  %2847 = vset.pattern.permute.xlu1 %v2865_v7  ;;  %v453_v28 = vmul.f32 %v3256_v26, %v280_v49 }
 0x12b   :  { %349 = vperm.xlu1 %2847, %v77_v29  }
 0x12c   :  { %v903_v32 = vadd.f32 %v839_v61, %v515_v22  ;;  %2643 = vmatprep.mubr.msk.f32.mxu0 %vm1013_vm0, %v966_v38  ;;  %v454_v22 = vmul.f32 %v3256_v26, %v285_v56  ;;  %v848_v38 = vmul.f32 %v3254_v24, %v3197_v2 }
 0x12e   :  { %v967_v1 = vmax.f32 %v903_v32, 0.0  ;;  %v250_v46 = vpop.permute.xlu1 %249  ;;  %v524_v61 = vadd.f32 %v3268_v30, %v454_v22  ;;  %v523_v32 = vadd.f32 %v3268_v30, %v453_v28 }
 0x12f   :  { %2848 = vset.pattern.permute.xlu1 %v2864_v0  ;;  %v447_v25 = vmul.f32 %v3256_v26, %v250_v46 }
 0x130   :  { %755 = vperm.xlu1 %2848, %v77_v29   ;;  %2644 = vmatmul.mubr.msk.f32.gmra.mxu0 %vm1013_vm0, %v967_v1  ;;  %v85_v1 = vld [vmem:[%s4114_s0 + $0x1d8] sm:$0xff] }
 0x131   :  { %2646 = vmatprep.mubr.msk.f32.mxu0 %vm1013_vm0, %v968_v48  ;;  %v517_v34 = vadd.f32 %v3268_v30, %v447_v25 }
 0x133   :  { %v676_v42 = vpop.permute.xlu1 %675 }
 0x134   :  { %v841_v36 = vmul.f32 %v3254_v24, %v676_v42  ;;  %2849 = vset.pattern.permute.xlu1 %v2865_v7  ;;  %v912_v42 = vadd.f32 %v848_v38, %v524_v61  ;;  %v3575_v38 = vld [vmem:[%s4119_s4] ss:$0 sm:$0xff]  ;;  %v856_v61 = vmul.f32 %v3254_v24, %v3217_v9 }
 0x135   :  { %354 = vperm.xlu1 %2849, %v78_v33  }
 0x136   :  { %v905_v52 = vadd.f32 %v841_v36, %v517_v34  ;;  %v976_v34 = vmax.f32 %v912_v42, 0.0 }
 0x138   :  { %v969_v37 = vmax.f32 %v905_v52, 0.0  ;;  %v255_v63 = vpop.permute.xlu1 %254  ;;  %v86_v52 = vld [vmem:[%s4114_s0 + $0x1e0] sm:$0xff] }
 0x139   :  { %2850 = vset.pattern.permute.xlu1 %v2864_v0  ;;  %v448_v43 = vmul.f32 %v3256_v26, %v255_v63  ;;  %v300_v63 = vpop.permute.xlu0 %299 }
 0x13a   :  { %759 = vperm.xlu1 %2850, %v78_v33   ;;  %2647 = vmatmul.mubr.msk.f32.gmra.mxu0 %vm1013_vm0, %v969_v37 }
 0x13b   :  { %v518_v50 = vadd.f32 %v3268_v30, %v448_v43 }
 0x13d   :  { %v680_v6 = vpop.permute.xlu1 %679 }
 0x13e   :  { %v842_v57 = vmul.f32 %v3254_v24, %v680_v6  ;;  %763 = vperm.xlu1 %2850, %v3214_v8  }
 0x140   :  { %v906_v59 = vadd.f32 %v842_v57, %v518_v50  ;;  %v305_v50 = vpop.permute.xlu0 %304 }
 0x141   :  { %v684_v47 = vpop.permute.xlu1 %683  ;;  %v458_v45 = vmul.f32 %v3256_v26, %v305_v50 }
 0x142   :  { %v970_v11 = vmax.f32 %v906_v59, 0.0  ;;  %v843_v10 = vmul.f32 %v3254_v24, %v684_v47  ;;  %2851 = vset.pattern.permute.xlu1 %v2865_v7  ;;  %v852_v47 = vmul.f32 %v3254_v24, %v3206_v5 }
 0x143   :  { %369 = vperm.xlu1 %2851, %v81_v3  }
 0x144   :  { %v907_v8 = vadd.f32 %v843_v10, %v519_v58  ;;  %2649 = vmatprep.mubr.msk.f32.mxu0 %vm1013_vm0, %v970_v11  ;;  %v457_v58 = vmul.f32 %v3256_v26, %v300_v63  ;;  %v528_v11 = vadd.f32 %v3268_v30, %v458_v45 }
 0x146   :  { %v971_v62 = vmax.f32 %v907_v8, 0.0  ;;  %v270_v44 = vpop.permute.xlu1 %269 }
 0x147   :  { %2852 = vset.pattern.permute.xlu1 %v2864_v0  ;;  %v451_v53 = vmul.f32 %v3256_v26, %v270_v44 }
 0x148   :  { %771 = vperm.xlu1 %2852, %v81_v3   ;;  %2650 = vmatmul.mubr.msk.f32.gmra.mxu0 %vm1013_vm0, %v971_v62  ;;  %v527_v62 = vadd.f32 %v3268_v30, %v457_v58 }
 0x149   :  { %2652 = vmatprep.mubr.msk.f32.mxu0 %vm1013_vm0, %v972_v14  ;;  %v521_v51 = vadd.f32 %v3268_v30, %v451_v53  ;;  %v916_v53 = vadd.f32 %v852_v47, %v528_v11 }
 0x14b   :  { %v692_v15 = vpop.permute.xlu1 %691 }
 0x14c   :  { %v845_v55 = vmul.f32 %v3254_v24, %v692_v15  ;;  %2853 = vset.pattern.permute.xlu1 %v2865_v7  ;;  %v980_v15 = vmax.f32 %v916_v53, 0.0 }
 0x14d   :  { %374 = vperm.xlu1 %2853, %v82_v41  }
 0x14e   :  { %v909_v19 = vadd.f32 %v845_v55, %v521_v51  ;;  %v320_v55 = vpop.permute.xlu0 %319 }
 0x150   :  { %v973_v21 = vmax.f32 %v909_v19, 0.0  ;;  %v275_v54 = vpop.permute.xlu1 %274 }
 0x151   :  { %2854 = vset.pattern.permute.xlu1 %v2864_v0  ;;  %v452_v27 = vmul.f32 %v3256_v26, %v275_v54 }
 0x152   :  { %775 = vperm.xlu1 %2854, %v82_v41   ;;  %2653 = vmatmul.mubr.msk.f32.gmra.mxu0 %vm1013_vm0, %v973_v21 }
 0x153   :  { %v522_v16 = vadd.f32 %v3268_v30, %v452_v27  ;;  %v325_v27 = vpop.permute.xlu0 %324 }
 0x155   :  { %v696_v29 = vpop.permute.xlu1 %695 }
 0x156   :  { %v846_v31 = vmul.f32 %v3254_v24, %v696_v29  ;;  %779 = vperm.xlu1 %2854, %v3229_v13   ;;  %v461_v29 = vmul.f32 %v3256_v26, %v320_v55 }
 0x157   :  { %v340_v11 = vpop.permute.xlu0 %339 }
 0x158   :  { %v910_v48 = vadd.f32 %v846_v31, %v522_v16  ;;  %v531_v42 = vadd.f32 %v3268_v30, %v461_v29 }
 0x159   :  { %v700_v46 = vpop.permute.xlu1 %699 }
 0x15a   :  { %v974_v25 = vmax.f32 %v910_v48, 0.0  ;;  %v847_v33 = vmul.f32 %v3254_v24, %v700_v46  ;;  %2855 = vset.pattern.permute.xlu1 %v2865_v7 }
 0x15b   :  { %389 = vperm.xlu1 %2855, %v85_v1   ;;  %v345_v55 = vpop.permute.xlu0 %344 }
 0x15c   :  { %v911_v13 = vadd.f32 %v847_v33, %v523_v32  ;;  %2655 = vmatprep.mubr.msk.f32.mxu0 %vm1013_vm0, %v974_v25 }
 0x15e   :  { %v975_v2 = vmax.f32 %v911_v13, 0.0  ;;  %v290_v18 = vpop.permute.xlu1 %289 }
 0x15f   :  { %2857 = vset.pattern.permute.xlu1 %v2864_v0  ;;  %v455_v36 = vmul.f32 %v3256_v26, %v290_v18 }
 0x160   :  { %787 = vperm.xlu1 %2857, %v85_v1   ;;  %2656 = vmatmul.mubr.msk.f32.gmra.mxu0 %vm1013_vm0, %v975_v2 }
 0x161   :  { %2658 = vmatprep.mubr.msk.f32.mxu0 %vm1013_vm0, %v976_v34  ;;  %v525_v39 = vadd.f32 %v3268_v30, %v455_v36 }
 0x163   :  { %v708_v37 = vpop.permute.xlu1 %707 }
 0x164   :  { %v849_v43 = vmul.f32 %v3254_v24, %v708_v37  ;;  %2858 = vset.pattern.permute.xlu1 %v2865_v7 }
 0x165   :  { %394 = vperm.xlu1 %2858, %v86_v52  }
 0x166   :  { %v913_v60 = vadd.f32 %v849_v43, %v525_v39 }
 0x168   :  { %v977_v40 = vmax.f32 %v913_v60, 0.0  ;;  %v295_v6 = vpop.permute.xlu1 %294 }
 0x169   :  { %2859 = vset.pattern.permute.xlu1 %v2864_v0  ;;  %v456_v57 = vmul.f32 %v3256_v26, %v295_v6 }
 0x16a   :  { %791 = vperm.xlu1 %2859, %v86_v52   ;;  %2659 = vmatmul.mubr.msk.f32.gmra.mxu0 %vm1013_vm0, %v977_v40 }
 0x16b   :  { %v526_v59 = vadd.f32 %v3268_v30, %v456_v57 }
 0x16d   :  { %v712_v4 = vpop.permute.xlu1 %711 }
 0x16e   :  { %v850_v3 = vmul.f32 %v3254_v24, %v712_v4  ;;  %795 = vperm.xlu1 %2859, %v3252_v23  }
 0x170   :  { %v914_v10 = vadd.f32 %v850_v3, %v526_v59 }
 0x171   :  { %v716_v8 = vpop.permute.xlu1 %715 }
 0x172   :  { %v978_v44 = vmax.f32 %v914_v10, 0.0  ;;  %v851_v14 = vmul.f32 %v3254_v24, %v716_v8  ;;  %2860 = vset.pattern.permute.xlu1 %v2865_v7 }
 0x173   :  { %409 = vperm.xlu1 %2860, %v89_v35  }
 0x174   :  { %v915_v23 = vadd.f32 %v851_v14, %v527_v62  ;;  %2661 = vmatprep.mubr.msk.f32.mxu0 %vm1013_vm0, %v978_v44 }
 0x176   :  { %v979_v5 = vmax.f32 %v915_v23, 0.0  ;;  %v310_v41 = vpop.permute.xlu1 %309 }
 0x177   :  { %2862 = vset.pattern.permute.xlu1 %v2864_v0  ;;  %v459_v49 = vmul.f32 %v3256_v26, %v310_v41  ;;  %v462_v0 = vmul.f32 %v3256_v26, %v325_v27 }
 0x178   :  { %803 = vperm.xlu1 %2862, %v89_v35   ;;  %2662 = vmatmul.mubr.msk.f32.gmra.mxu0 %vm1013_vm0, %v979_v5 }
 0x179   :  { %2664 = vmatprep.mubr.msk.f32.mxu0 %vm1013_vm0, %v980_v15  ;;  %v529_v7 = vadd.f32 %v3268_v30, %v459_v49  ;;  %v532_v32 = vadd.f32 %v3268_v30, %v462_v0  ;;  %v465_v0 = vmul.f32 %v3256_v26, %v340_v11 }
 0x17b   :  { %v724_v51 = vpop.permute.xlu1 %723  ;;  %v920_v34 = vadd.f32 %v856_v61, %v532_v32 }
 0x17c   :  { %v853_v19 = vmul.f32 %v3254_v24, %v724_v51 }
 0x17d   :  { %v984_v40 = vmax.f32 %v920_v34, 0.0 }
 0x17e   :  { %v917_v21 = vadd.f32 %v853_v19, %v529_v7 }
 0x180   :  { %v981_v54 = vmax.f32 %v917_v21, 0.0  ;;  %v315_v56 = vpop.permute.xlu1 %314 }
 0x181   :  { %v460_v22 = vmul.f32 %v3256_v26, %v315_v56  ;;  %v466_v56 = vmul.f32 %v3256_v26, %v345_v55 }
 0x182   :  { %2665 = vmatmul.mubr.msk.f32.gmra.mxu0 %vm1013_vm0, %v981_v54 }
 0x183   :  { %v530_v16 = vadd.f32 %v3268_v30, %v460_v22 }
 0x185   :  { %v728_v28 = vpop.permute.xlu1 %727 }
 0x186   :  { %v854_v31 = vmul.f32 %v3254_v24, %v728_v28 }
 0x187   :  { %v2603_v48 = vpop.f32.mrf.mxu0 }
 0x188   :  { %v918_v1 = vadd.f32 %v854_v31, %v530_v16  ;;  %v1290_v46 = vadd.f32 %v2603_v48, %v3575_v38 }
 0x189   :  { %v1284_v25 = vpop.f32.mrf.mxu0  ;;  %v732_v33 = vpop.permute.xlu1 %731 }
 0x18a   :  { %v982_v13 = vmax.f32 %v918_v1, 0.0  ;;  %v1285_v2 = vadd.f32 %v3575_v38, %v1284_v25  ;;  %v855_v18 = vmul.f32 %v3254_v24, %v732_v33  ;;  %v1604_v9 = vmax.f32 %v1290_v46, 0.0 }
 0x18b   :  { %v860_v1 = vmul.f32 %v3254_v24, %v3222_v12  ;;  %v536_v46 = vadd.f32 %v3268_v30, %v466_v56 }
 0x18c   :  { %v1603_v36 = vmax.f32 %v1285_v2, 0.0  ;;  %v919_v52 = vadd.f32 %v855_v18, %v531_v42  ;;  %v2606_v37 = vpop.f32.mrf.mxu0  ;;  %2667 = vmatprep.mubr.msk.f32.mxu0 %vm1013_vm0, %v982_v13  ;;  %v535_v13 = vadd.f32 %v3268_v30, %v465_v0 }
 0x18d   :  { %v1300_v39 = vadd.f32 %v2606_v37, %v3575_v38 }
 0x18e   :  { %v983_v63 = vmax.f32 %v919_v52, 0.0  ;;  %v1294_v43 = vpop.f32.mrf.mxu0  ;;  %2699 = vmatprep.mubr.msk.f32.mxu1 %vm1013_vm0, %v1603_v36  ;;  %v330_v60 = vpop.permute.xlu1 %329 }
 0x18f   :  { %v1295_v6 = vadd.f32 %v3575_v38, %v1294_v43  ;;  %2700 = vmatmul.mubr.msk.f32.vlgmr.msra.gmra.mxu1 %vm1013_vm0, %v1604_v9  ;;  %v463_v50 = vmul.f32 %v3256_v26, %v330_v60  ;;  %v1606_v4 = vmax.f32 %v1300_v39, 0.0  ;;  %v924_v9 = vadd.f32 %v860_v1, %v536_v46 }
 0x190   :  { %v2609_v57 = vpop.f32.mrf.mxu0  ;;  %2668 = vmatmul.mubr.msk.f32.gmra.mxu0 %vm1013_vm0, %v983_v63 }
 0x191   :  { %v1605_v45 = vmax.f32 %v1295_v6, 0.0  ;;  %2670 = vmatprep.mubr.msk.f32.mxu0 %vm1013_vm0, %v984_v40  ;;  %v1310_v58 = vadd.f32 %v2609_v57, %v3575_v38  ;;  %v533_v10 = vadd.f32 %v3268_v30, %v463_v50 }
 0x192   :  { %v1304_v59 = vpop.f32.mrf.mxu0 }
 0x193   :  { %v1305_v3 = vadd.f32 %v3575_v38, %v1304_v59  ;;  %2702 = vmatprep.mubr.msk.f32.mxu1 %vm1013_vm0, %v1605_v45  ;;  %v740_v47 = vpop.permute.xlu1 %739  ;;  %v1608_v44 = vmax.f32 %v1310_v58, 0.0  ;;  %v988_v45 = vmax.f32 %v924_v9, 0.0 }
 0x194   :  { %v857_v35 = vmul.f32 %v3254_v24, %v740_v47  ;;  %v2612_v8 = vpop.f32.mrf.mxu0  ;;  %2703 = vmatmul.mubr.msk.f32.gmra.mxu1 %vm1013_vm0, %v1606_v4 }
 0x195   :  { %v1607_v62 = vmax.f32 %v1305_v3, 0.0  ;;  %v1320_v53 = vadd.f32 %v2612_v8, %v3575_v38 }
 0x196   :  { %v921_v14 = vadd.f32 %v857_v35, %v533_v10  ;;  %v1314_v23 = vpop.f32.mrf.mxu0 }
 0x197   :  { %v1315_v5 = vadd.f32 %v3575_v38, %v1314_v23  ;;  %2705 = vmatprep.mubr.msk.f32.mxu1 %vm1013_vm0, %v1607_v62  ;;  %v1610_v7 = vmax.f32 %v1320_v53, 0.0  ;;  %v360_v62 = vpop.permute.xlu0 %359 }
 0x198   :  { %v985_v41 = vmax.f32 %v921_v14, 0.0  ;;  %v2615_v15 = vpop.f32.mrf.mxu0  ;;  %2706 = vmatmul.mubr.msk.f32.gmra.mxu1 %vm1013_vm0, %v1608_v44  ;;  %v335_v49 = vpop.permute.xlu1 %334  ;;  %v3639_v44 = vld [vmem:[%s4117_s2] ss:$0 sm:$0xff] }
 0x199   :  { %v1609_v51 = vmax.f32 %v1315_v5, 0.0  ;;  %v1330_v19 = vadd.f32 %v2615_v15, %v3575_v38  ;;  %v464_v21 = vmul.f32 %v3256_v26, %v335_v49 }
 0x19a   :  { %v1324_v54 = vpop.f32.mrf.mxu0  ;;  %2671 = vmatmul.mubr.msk.f32.gmra.mxu0 %vm1013_vm0, %v985_v41 }
 0x19b   :  { %v1325_v27 = vadd.f32 %v3575_v38, %v1324_v54  ;;  %2708 = vmatprep.mubr.msk.f32.mxu1 %vm1013_vm0, %v1609_v51  ;;  %v1612_v16 = vmax.f32 %v1330_v19, 0.0  ;;  %v534_v31 = vadd.f32 %v3268_v30, %v464_v21  ;;  %v365_v51 = vpop.permute.xlu0 %364 }
 0x19c   :  { %v2618_v22 = vpop.f32.mrf.mxu0  ;;  %2709 = vmatmul.mubr.msk.f32.gmra.mxu1 %vm1013_vm0, %v1610_v7  ;;  %v470_v19 = vmul.f32 %v3256_v26, %v365_v51 }
 0x19d   :  { %v1611_v28 = vmax.f32 %v1325_v27, 0.0  ;;  %v744_v29 = vpop.permute.xlu1 %743  ;;  %v1340_v61 = vadd.f32 %v2618_v22, %v3575_v38  ;;  %v469_v22 = vmul.f32 %v3256_v26, %v360_v62 }
 0x19e   :  { %v858_v32 = vmul.f32 %v3254_v24, %v744_v29  ;;  %v1334_v48 = vpop.f32.mrf.mxu0  ;;  %v864_v29 = vmul.f32 %v3254_v24, %v3236_v17 }
 0x19f   :  { %v1335_v25 = vadd.f32 %v3575_v38, %v1334_v48  ;;  %2711 = vmatprep.mubr.msk.f32.mxu1 %vm1013_vm0, %v1611_v28  ;;  %v1614_v34 = vmax.f32 %v1340_v61, 0.0  ;;  %v539_v1 = vadd.f32 %v3639_v44, %v469_v22 }
 0x1a0   :  { %v922_v33 = vadd.f32 %v858_v32, %v534_v31  ;;  %v2621_v42 = vpop.f32.mrf.mxu0  ;;  %2712 = vmatmul.mubr.msk.f32.gmra.mxu1 %vm1013_vm0, %v1612_v16  ;;  %v540_v16 = vadd.f32 %v3639_v44, %v470_v19 }
 0x1a1   :  { %v1613_v2 = vmax.f32 %v1335_v25, 0.0  ;;  %v748_v18 = vpop.permute.xlu1 %747  ;;  %v1350_v52 = vadd.f32 %v2621_v42, %v3575_v38 }
 0x1a2   :  { %v986_v36 = vmax.f32 %v922_v33, 0.0  ;;  %v859_v12 = vmul.f32 %v3254_v24, %v748_v18  ;;  %v1344_v37 = vpop.f32.mrf.mxu0  ;;  %v928_v33 = vadd.f32 %v864_v29, %v540_v16 }
 0x1a3   :  { %v1345_v63 = vadd.f32 %v3575_v38, %v1344_v37  ;;  %2714 = vmatprep.mubr.msk.f32.mxu1 %vm1013_vm0, %v1613_v2  ;;  %v1616_v60 = vmax.f32 %v1350_v52, 0.0 }
 0x1a4   :  { %v923_v39 = vadd.f32 %v859_v12, %v535_v13  ;;  %v2624_v43 = vpop.f32.mrf.mxu0  ;;  %2673 = vmatprep.mubr.msk.f32.mxu0 %vm1013_vm0, %v986_v36  ;;  %2715 = vmatmul.mubr.msk.f32.gmra.mxu1 %vm1013_vm0, %v1614_v34  ;;  %v992_v2 = vmax.f32 %v928_v33, 0.0  ;;  %v380_v36 = vpop.permute.xlu0 %379 }
 0x1a5   :  { %v1615_v30 = vmax.f32 %v1345_v63, 0.0  ;;  %v1360_v6 = vadd.f32 %v2624_v43, %v3575_v38 }
 0x1a6   :  { %v987_v40 = vmax.f32 %v923_v39, 0.0  ;;  %v1354_v50 = vpop.f32.mrf.mxu0  ;;  %v350_v57 = vpop.permute.xlu1 %349 }
 0x1a7   :  { %v1355_v4 = vadd.f32 %v3575_v38, %v1354_v50  ;;  %2717 = vmatprep.mubr.msk.f32.mxu1 %vm1013_vm0, %v1615_v30  ;;  %v467_v58 = vmul.f32 %v3256_v26, %v350_v57  ;;  %v1618_v47 = vmax.f32 %v1360_v6, 0.0 }
 0x1a8   :  { %v2627_v59 = vpop.f32.mrf.mxu0  ;;  %2674 = vmatmul.mubr.msk.f32.gmra.mxu0 %vm1013_vm0, %v987_v40  ;;  %2718 = vmatmul.mubr.msk.f32.gmra.mxu1 %vm1013_vm0, %v1616_v60  ;;  %v385_v40 = vpop.permute.xlu0 %384 }
 0x1a9   :  { %v1617_v3 = vmax.f32 %v1355_v4, 0.0  ;;  %2676 = vmatprep.mubr.msk.f32.mxu0 %vm1013_vm0, %v988_v45  ;;  %v1370_v11 = vadd.f32 %v2627_v59, %v3575_v38  ;;  %v537_v14 = vadd.f32 %v3639_v44, %v467_v58  ;;  %v474_v4 = vmul.f32 %v3256_v26, %v385_v40 }
 0x1aa   :  { %v1364_v10 = vpop.f32.mrf.mxu0 }
 0x1ab   :  { %v1365_v35 = vadd.f32 %v3575_v38, %v1364_v10  ;;  %2720 = vmatprep.mubr.msk.f32.mxu1 %vm1013_vm0, %v1617_v3  ;;  %v756_v8 = vpop.permute.xlu1 %755  ;;  %v1620_v5 = vmax.f32 %v1370_v11, 0.0  ;;  %v473_v11 = vmul.f32 %v3256_v26, %v380_v36 }
 0x1ac   :  { %v861_v53 = vmul.f32 %v3254_v24, %v756_v8  ;;  %2721 = vmatmul.mubr.msk.f32.gmra.mxu1 %vm1013_vm0, %v1618_v47  ;;  %v544_v8 = vadd.f32 %v3639_v44, %v474_v4 }
 0x1ad   :  { %v1619_v23 = vmax.f32 %v1365_v35, 0.0 }
 0x1ae   :  { %v925_v41 = vadd.f32 %v861_v53, %v537_v14 }
 0x1af   :  { %2723 = vmatprep.mubr.msk.f32.mxu1 %vm1013_vm0, %v1619_v23  ;;  %v868_v23 = vmul.f32 %v3254_v24, %v3240_v20 }
 0x1b0   :  { %v989_v15 = vmax.f32 %v925_v41, 0.0  ;;  %2724 = vmatmul.mubr.msk.f32.gmra.mxu1 %vm1013_vm0, %v1620_v5  ;;  %v355_v49 = vpop.permute.xlu1 %354  ;;  %v543_v41 = vadd.f32 %v3639_v44, %v473_v11 }
 0x1b1   :  { %v468_v55 = vmul.f32 %v3256_v26, %v355_v49  ;;  %v932_v51 = vadd.f32 %v868_v23, %v544_v8 }
 0x1b2   :  { %v2630_v7 = vpop.f32.mrf.mxu0  ;;  %2677 = vmatmul.mubr.msk.f32.gmra.mxu0 %vm1013_vm0, %v989_v15 }
 0x1b3   :  { %v1380_v21 = vadd.f32 %v2630_v7, %v3575_v38  ;;  %v538_v0 = vadd.f32 %v3639_v44, %v468_v55 }
 0x1b4   :  { %v1374_v54 = vpop.f32.mrf.mxu0 }
 0x1b5   :  { %v1375_v56 = vadd.f32 %v3575_v38, %v1374_v54  ;;  %v760_v27 = vpop.permute.xlu1 %759  ;;  %v1622_v61 = vmax.f32 %v1380_v21, 0.0  ;;  %v996_v21 = vmax.f32 %v932_v51, 0.0  ;;  %v400_v54 = vpop.permute.xlu0 %399 }
 0x1b6   :  { %v862_v28 = vmul.f32 %v3254_v24, %v760_v27  ;;  %v477_v36 = vmul.f32 %v3256_v26, %v400_v54 }
 0x1b7   :  { %v1621_v31 = vmax.f32 %v1375_v56, 0.0 }
 0x1b8   :  { %v926_v32 = vadd.f32 %v862_v28, %v538_v0 }
 0x1b9   :  { %2726 = vmatprep.mubr.msk.f32.mxu1 %vm1013_vm0, %v1621_v31  ;;  %v764_v48 = vpop.permute.xlu1 %763 }
 0x1ba   :  { %v990_v46 = vmax.f32 %v926_v32, 0.0  ;;  %v863_v25 = vmul.f32 %v3254_v24, %v764_v48  ;;  %2727 = vmatmul.mubr.msk.f32.gmra.mxu1 %vm1013_vm0, %v1622_v61  ;;  %v405_v61 = vpop.permute.xlu0 %404 }
 0x1bc   :  { %v927_v42 = vadd.f32 %v863_v25, %v539_v1  ;;  %2679 = vmatprep.mubr.msk.f32.mxu0 %vm1013_vm0, %v990_v46 }
 0x1be   :  { %v991_v17 = vmax.f32 %v927_v42, 0.0  ;;  %v370_v13 = vpop.permute.xlu1 %369  ;;  %v478_v42 = vmul.f32 %v3256_v26, %v405_v61 }
 0x1bf   :  { %v471_v18 = vmul.f32 %v3256_v26, %v370_v13 }
 0x1c0   :  { %v2633_v34 = vpop.f32.mrf.mxu0  ;;  %2680 = vmatmul.mubr.msk.f32.gmra.mxu0 %vm1013_vm0, %v991_v17  ;;  %v800_v17 = vpop.permute.xlu0 %799 }
 0x1c1   :  { %2682 = vmatprep.mubr.msk.f32.mxu0 %vm1013_vm0, %v992_v2  ;;  %v1390_v52 = vadd.f32 %v2633_v34, %v3575_v38  ;;  %v541_v63 = vadd.f32 %v3639_v44, %v471_v18 }
 0x1c2   :  { %v1384_v12 = vpop.f32.mrf.mxu0 }
 0x1c3   :  { %v1385_v37 = vadd.f32 %v3575_v38, %v1384_v12  ;;  %v772_v9 = vpop.permute.xlu1 %771  ;;  %v1624_v30 = vmax.f32 %v1390_v52, 0.0 }
 0x1c4   :  { %v865_v39 = vmul.f32 %v3254_v24, %v772_v9  ;;  %v872_v9 = vmul.f32 %v3254_v24, %v800_v17 }
 0x1c5   :  { %v1623_v43 = vmax.f32 %v1385_v37, 0.0  ;;  %v548_v37 = vadd.f32 %v3639_v44, %v478_v42 }
 0x1c6   :  { %v929_v60 = vadd.f32 %v865_v39, %v541_v63 }
 0x1c7   :  { %2729 = vmatprep.mubr.msk.f32.mxu1 %vm1013_vm0, %v1623_v43 }
 0x1c8   :  { %v993_v6 = vmax.f32 %v929_v60, 0.0  ;;  %2730 = vmatmul.mubr.msk.f32.gmra.mxu1 %vm1013_vm0, %v1624_v30  ;;  %v375_v50 = vpop.permute.xlu1 %374  ;;  %v547_v60 = vadd.f32 %v3639_v44, %v477_v36 }
 0x1c9   :  { %v472_v57 = vmul.f32 %v3256_v26, %v375_v50  ;;  %v936_v50 = vadd.f32 %v872_v9, %v548_v37 }
 0x1ca   :  { %v2636_v45 = vpop.f32.mrf.mxu0  ;;  %2683 = vmatmul.mubr.msk.f32.gmra.mxu0 %vm1013_vm0, %v993_v6 }
 0x1cb   :  { %v1400_v58 = vadd.f32 %v2636_v45, %v3575_v38  ;;  %v542_v10 = vadd.f32 %v3639_v44, %v472_v57 }
 0x1cc   :  { %v1394_v59 = vpop.f32.mrf.mxu0 }
 0x1cd   :  { %v1395_v3 = vadd.f32 %v3575_v38, %v1394_v59  ;;  %v776_v47 = vpop.permute.xlu1 %775  ;;  %v1626_v14 = vmax.f32 %v1400_v58, 0.0  ;;  %v1000_v58 = vmax.f32 %v936_v50, 0.0 }
 0x1ce   :  { %v866_v35 = vmul.f32 %v3254_v24, %v776_v47 }
 0x1cf   :  { %v1625_v62 = vmax.f32 %v1395_v3, 0.0 }
 0x1d0   :  { %v930_v53 = vadd.f32 %v866_v35, %v542_v10 }
 0x1d1   :  { %2732 = vmatprep.mubr.msk.f32.mxu1 %vm1013_vm0, %v1625_v62  ;;  %v780_v5 = vpop.permute.xlu1 %779 }
 0x1d2   :  { %v994_v15 = vmax.f32 %v930_v53, 0.0  ;;  %v867_v49 = vmul.f32 %v3254_v24, %v780_v5  ;;  %2733 = vmatmul.mubr.msk.f32.gmra.mxu1 %vm1013_vm0, %v1626_v14 }
 0x1d4   :  { %v931_v55 = vadd.f32 %v867_v49, %v543_v41  ;;  %2685 = vmatprep.mubr.msk.f32.mxu0 %vm1013_vm0, %v994_v15 }
 0x1d6   :  { %v995_v7 = vmax.f32 %v931_v55, 0.0  ;;  %v390_v19 = vpop.permute.xlu1 %389 }
 0x1d7   :  { %v475_v20 = vmul.f32 %v3256_v26, %v390_v19 }
 0x1d8   :  { %v2639_v56 = vpop.f32.mrf.mxu0  ;;  %2686 = vmatmul.mubr.msk.f32.gmra.mxu0 %vm1013_vm0, %v995_v7 }
 0x1d9   :  { %2688 = vmatprep.mubr.msk.f32.mxu0 %vm1013_vm0, %v996_v21  ;;  %v1410_v27 = vadd.f32 %v2639_v56, %v3575_v38  ;;  %v545_v29 = vadd.f32 %v3639_v44, %v475_v20 }
 0x1da   :  { %v1404_v22 = vpop.f32.mrf.mxu0 }
 0x1db   :  { %v1405_v0 = vadd.f32 %v3575_v38, %v1404_v22  ;;  %v788_v28 = vpop.permute.xlu1 %787  ;;  %v1628_v32 = vmax.f32 %v1410_v27, 0.0 }
 0x1dc   :  { %v869_v16 = vmul.f32 %v3254_v24, %v788_v28 }
 0x1dd   :  { %v1627_v31 = vmax.f32 %v1405_v0, 0.0 }
 0x1de   :  { %v933_v48 = vadd.f32 %v869_v16, %v545_v29 }
 0x1df   :  { %2735 = vmatprep.mubr.msk.f32.mxu1 %vm1013_vm0, %v1627_v31 }
 0x1e0   :  { %v997_v1 = vmax.f32 %v933_v48, 0.0  ;;  %2736 = vmatmul.mubr.msk.f32.gmra.mxu1 %vm1013_vm0, %v1628_v32  ;;  %v395_v46 = vpop.permute.xlu1 %394 }
 0x1e1   :  { %v476_v25 = vmul.f32 %v3256_v26, %v395_v46 }
 0x1e2   :  { %v2642_v33 = vpop.f32.mrf.mxu0  ;;  %2689 = vmatmul.mubr.msk.f32.gmra.mxu0 %vm1013_vm0, %v997_v1 }
 0x1e3   :  { %v1420_v13 = vadd.f32 %v2642_v33, %v3575_v38  ;;  %v546_v52 = vadd.f32 %v3639_v44, %v476_v25 }
 0x1e4   :  { %v1414_v2 = vpop.f32.mrf.mxu0 }
 0x1e5   :  { %v1415_v18 = vadd.f32 %v3575_v38, %v1414_v2  ;;  %v792_v34 = vpop.permute.xlu1 %791  ;;  %v1630_v39 = vmax.f32 %v1420_v13, 0.0 }
 0x1e6   :  { %v870_v12 = vmul.f32 %v3254_v24, %v792_v34 }
 0x1e7   :  { %v1629_v63 = vmax.f32 %v1415_v18, 0.0 }
 0x1e8   :  { %v934_v43 = vadd.f32 %v870_v12, %v546_v52 }
 0x1e9   :  { %2738 = vmatprep.mubr.msk.f32.mxu1 %vm1013_vm0, %v1629_v63  ;;  %v796_v30 = vpop.permute.xlu1 %795 }
 0x1ea   :  { %v998_v40 = vmax.f32 %v934_v43, 0.0  ;;  %v871_v6 = vmul.f32 %v3254_v24, %v796_v30  ;;  %2739 = vmatmul.mubr.msk.f32.gmra.mxu1 %vm1013_vm0, %v1630_v39  ;;  %v3752_v30 = vld [vmem:[%s4120_s6] ss:$0 sm:$0xff] }
 0x1ec   :  { %v935_v57 = vadd.f32 %v871_v6, %v547_v60  ;;  %2691 = vmatprep.mubr.msk.f32.mxu0 %vm1013_vm0, %v998_v40 }
 0x1ee   :  { %v999_v45 = vmax.f32 %v935_v57, 0.0  ;;  %v410_v4 = vpop.permute.xlu1 %409 }
 0x1ef   :  { %v479_v59 = vmul.f32 %v3256_v26, %v410_v4 }
 0x1f0   :  { %v2645_v3 = vpop.f32.mrf.mxu0  ;;  %2692 = vmatmul.mubr.msk.f32.gmra.mxu0 %vm1013_vm0, %v999_v45 }
 0x1f1   :  { %2694 = vmatprep.mubr.msk.f32.mxu0 %vm1013_vm0, %v1000_v58  ;;  %v1430_v47 = vadd.f32 %v2645_v3, %v3575_v38  ;;  %v549_v8 = vadd.f32 %v3639_v44, %v479_v59 }
 0x1f2   :  { %v1424_v11 = vpop.f32.mrf.mxu0 }
 0x1f3   :  { %v1425_v10 = vadd.f32 %v3575_v38, %v1424_v11  ;;  %v804_v35 = vpop.permute.xlu1 %803  ;;  %v1632_v53 = vmax.f32 %v1430_v47, 0.0 }
 0x1f4   :  { %v873_v62 = vmul.f32 %v3254_v24, %v804_v35 }
 0x1f5   :  { %v1631_v14 = vmax.f32 %v1425_v10, 0.0 }
 0x1f6   :  { %v937_v23 = vadd.f32 %v873_v62, %v549_v8 }
 0x1f7   :  { %2741 = vmatprep.mubr.msk.f32.mxu1 %vm1013_vm0, %v1631_v14 }
 0x1f8   :  { %v1001_v26 = vmax.f32 %v937_v23, 0.0  ;;  %2742 = vmatmul.mubr.msk.f32.gmra.mxu1 %vm1013_vm0, %v1632_v53 }
 0x1fa   :  { %v2648_v5 = vpop.f32.mrf.mxu0  ;;  %2695 = vmatmul.mubr.msk.f32.gmra.mxu0 %vm1013_vm0, %v1001_v26 }
 0x1fb   :  { %v1440_v41 = vadd.f32 %v2648_v5, %v3575_v38 }
 0x1fc   :  { %v1434_v15 = vpop.f32.mrf.mxu0 }
 0x1fd   :  { %v1435_v49 = vadd.f32 %v3575_v38, %v1434_v15  ;;  %v1634_v44 = vmax.f32 %v1440_v41, 0.0 }
 0x1ff   :  { %v1633_v51 = vmax.f32 %v1435_v49, 0.0 }
 0x201   :  { %2744 = vmatprep.mubr.msk.f32.mxu1 %vm1013_vm0, %v1633_v51 }
 0x202   :  { %2745 = vmatmul.mubr.msk.f32.gmra.mxu1 %vm1013_vm0, %v1634_v44 }
 0x208   :  { %v2651_v24 = vpop.f32.mrf.mxu0 }
 0x209   :  { %v1450_v55 = vadd.f32 %v2651_v24, %v3575_v38 }
 0x20a   :  { %v1444_v7 = vpop.f32.mrf.mxu0 }
 0x20b   :  { %v1445_v19 = vadd.f32 %v3575_v38, %v1444_v7  ;;  %v1636_v54 = vmax.f32 %v1450_v55, 0.0 }
 0x20d   :  { %v1635_v21 = vmax.f32 %v1445_v19, 0.0 }
 0x20f   :  { %2747 = vmatprep.mubr.msk.f32.mxu1 %vm1013_vm0, %v1635_v21 }
 0x210   :  { %2748 = vmatmul.mubr.msk.f32.gmra.mxu1 %vm1013_vm0, %v1636_v54 }
 0x212   :  { %v2654_v20 = vpop.f32.mrf.mxu0 }
 0x213   :  { %v1460_v56 = vadd.f32 %v2654_v20, %v3575_v38 }
 0x214   :  { %v1454_v27 = vpop.f32.mrf.mxu0 }
 0x215   :  { %v1455_v22 = vadd.f32 %v3575_v38, %v1454_v27  ;;  %v1638_v28 = vmax.f32 %v1460_v56, 0.0 }
 0x217   :  { %v1637_v0 = vmax.f32 %v1455_v22, 0.0 }
 0x219   :  { %2750 = vmatprep.mubr.msk.f32.mxu1 %vm1013_vm0, %v1637_v0 }
 0x21a   :  { %2751 = vmatmul.mubr.msk.f32.gmra.mxu1 %vm1013_vm0, %v1638_v28 }
 0x220   :  { %v2657_v29 = vpop.f32.mrf.mxu0 }
 0x221   :  { %v1470_v16 = vadd.f32 %v2657_v29, %v3575_v38 }
 0x222   :  { %v1464_v31 = vpop.f32.mrf.mxu0 }
 0x223   :  { %v1465_v61 = vadd.f32 %v3575_v38, %v1464_v31  ;;  %v1640_v48 = vmax.f32 %v1470_v16, 0.0 }
 0x225   :  { %v1639_v32 = vmax.f32 %v1465_v61, 0.0 }
 0x227   :  { %2753 = vmatprep.mubr.msk.f32.mxu1 %vm1013_vm0, %v1639_v32 }
 0x228   :  { %2754 = vmatmul.mubr.msk.f32.gmra.mxu1 %vm1013_vm0, %v1640_v48 }
 0x22a   :  { %v2660_v1 = vpop.f32.mrf.mxu0 }
 0x22b   :  { %v1480_v46 = vadd.f32 %v2660_v1, %v3575_v38 }
 0x22c   :  { %v1474_v25 = vpop.f32.mrf.mxu0 }
 0x22d   :  { %v1475_v33 = vadd.f32 %v3575_v38, %v1474_v25  ;;  %v1642_v17 = vmax.f32 %v1480_v46, 0.0 }
 0x22f   :  { %v1641_v42 = vmax.f32 %v1475_v33, 0.0 }
 0x231   :  { %2756 = vmatprep.mubr.msk.f32.mxu1 %vm1013_vm0, %v1641_v42 }
 0x232   :  { %2757 = vmatmul.mubr.msk.f32.gmra.mxu1 %vm1013_vm0, %v1642_v17 }
 0x238   :  { %v2663_v13 = vpop.f32.mrf.mxu0 }
 0x239   :  { %v1490_v2 = vadd.f32 %v2663_v13, %v3575_v38 }
 0x23a   :  { %v1484_v18 = vpop.f32.mrf.mxu0 }
 0x23b   :  { %v1485_v34 = vadd.f32 %v3575_v38, %v1484_v18  ;;  %v1644_v52 = vmax.f32 %v1490_v2, 0.0 }
 0x23d   :  { %v1643_v36 = vmax.f32 %v1485_v34, 0.0 }
 0x23f   :  { %2759 = vmatprep.mubr.msk.f32.mxu1 %vm1013_vm0, %v1643_v36 }
 0x240   :  { %2760 = vmatmul.mubr.msk.f32.gmra.mxu1 %vm1013_vm0, %v1644_v52 }
 0x242   :  { %v2666_v12 = vpop.f32.mrf.mxu0 }
 0x243   :  { %v1500_v37 = vadd.f32 %v2666_v12, %v3575_v38 }
 0x244   :  { %v1494_v9 = vpop.f32.mrf.mxu0 }
 0x245   :  { %v1495_v63 = vadd.f32 %v3575_v38, %v1494_v9  ;;  %v1646_v43 = vmax.f32 %v1500_v37, 0.0 }
 0x247   :  { %v1645_v39 = vmax.f32 %v1495_v63, 0.0 }
 0x249   :  { %2762 = vmatprep.mubr.msk.f32.mxu1 %vm1013_vm0, %v1645_v39 }
 0x24a   :  { %2763 = vmatmul.mubr.msk.f32.gmra.mxu1 %vm1013_vm0, %v1646_v43 }
 0x24f   :  { %v2701_v60 = vpop.f32.mrf.mxu1 }
 0x250   :  { %v1942_v40 = vadd.f32 %v2701_v60, %v3752_v30  ;;  %v2669_v6 = vpop.f32.mrf.mxu0 }
 0x251   :  { %v1936_v50 = vpop.f32.mrf.mxu1  ;;  %v1510_v57 = vadd.f32 %v2669_v6, %v3575_v38 }
 0x252   :  { %2257 = vst.msk [vmem:[%s4121_s7 + $0x8] sm:$0xff] %vm2255_vm1, %v1942_v40  ;;  %v1937_v45 = vadd.f32 %v3752_v30, %v1936_v50  ;;  %v1504_v4 = vpop.f32.mrf.mxu0 }
 0x253   :  { %v1505_v58 = vadd.f32 %v3575_v38, %v1504_v4  ;;  %v1648_v11 = vmax.f32 %v1510_v57, 0.0 }
 0x254   :  { %2256 = vst.msk [vmem:[%s4121_s7] sm:$0xff] %vm2255_vm1, %v1937_v45  ;;  %v2704_v59 = vpop.f32.mrf.mxu1 }
 0x255   :  { %v1647_v3 = vmax.f32 %v1505_v58, 0.0  ;;  %v1952_v47 = vadd.f32 %v2704_v59, %v3752_v30 }
 0x256   :  { %v1946_v10 = vpop.f32.mrf.mxu1 }
 0x257   :  { %2259 = vst.msk [vmem:[%s4121_s7 + $0x18] sm:$0xff] %vm2255_vm1, %v1952_v47  ;;  %v1947_v35 = vadd.f32 %v3752_v30, %v1946_v10  ;;  %2765 = vmatprep.mubr.msk.f32.mxu1 %vm1013_vm0, %v1647_v3 }
 0x258   :  { %v2707_v8 = vpop.f32.mrf.mxu1  ;;  %2766 = vmatmul.mubr.msk.f32.gmra.mxu1 %vm1013_vm0, %v1648_v11 }
 0x259   :  { %2258 = vst.msk [vmem:[%s4121_s7 + $0x10] sm:$0xff] %vm2255_vm1, %v1947_v35  ;;  %v1962_v62 = vadd.f32 %v2707_v8, %v3752_v30 }
 0x25a   :  { %v2672_v14 = vpop.f32.mrf.mxu0  ;;  %v1956_v53 = vpop.f32.mrf.mxu1 }
 0x25b   :  { %2261 = vst.msk [vmem:[%s4121_s7 + $0x28] sm:$0xff] %vm2255_vm1, %v1962_v62  ;;  %v1957_v23 = vadd.f32 %v3752_v30, %v1956_v53  ;;  %v1520_v26 = vadd.f32 %v2672_v14, %v3575_v38 }
 0x25c   :  { %v1514_v5 = vpop.f32.mrf.mxu0  ;;  %v2710_v41 = vpop.f32.mrf.mxu1 }
 0x25d   :  { %2260 = vst.msk [vmem:[%s4121_s7 + $0x20] sm:$0xff] %vm2255_vm1, %v1957_v23  ;;  %v1515_v15 = vadd.f32 %v3575_v38, %v1514_v5  ;;  %v1972_v49 = vadd.f32 %v2710_v41, %v3752_v30  ;;  %v1650_v55 = vmax.f32 %v1520_v26, 0.0 }
 0x25e   :  { %v1966_v51 = vpop.f32.mrf.mxu1 }
 0x25f   :  { %v1649_v44 = vmax.f32 %v1515_v15, 0.0  ;;  %2263 = vst.msk [vmem:[%s4121_s7 + $0x38] sm:$0xff] %vm2255_vm1, %v1972_v49  ;;  %v1967_v24 = vadd.f32 %v3752_v30, %v1966_v51 }
 0x260   :  { %v2713_v7 = vpop.f32.mrf.mxu1 }
 0x261   :  { %2262 = vst.msk [vmem:[%s4121_s7 + $0x30] sm:$0xff] %vm2255_vm1, %v1967_v24  ;;  %v1982_v19 = vadd.f32 %v2713_v7, %v3752_v30  ;;  %2768 = vmatprep.mubr.msk.f32.mxu1 %vm1013_vm0, %v1649_v44 }
 0x262   :  { %v1976_v21 = vpop.f32.mrf.mxu1  ;;  %2769 = vmatmul.mubr.msk.f32.gmra.mxu1 %vm1013_vm0, %v1650_v55 }
 0x263   :  { %2265 = vst.msk [vmem:[%s4121_s7 + $0x48] sm:$0xff] %vm2255_vm1, %v1982_v19  ;;  %v1977_v54 = vadd.f32 %v3752_v30, %v1976_v21 }
 0x264   :  { %v2716_v20 = vpop.f32.mrf.mxu1 }
 0x265   :  { %2264 = vst.msk [vmem:[%s4121_s7 + $0x40] sm:$0xff] %vm2255_vm1, %v1977_v54  ;;  %v1992_v56 = vadd.f32 %v2716_v20, %v3752_v30 }
 0x266   :  { %v1986_v27 = vpop.f32.mrf.mxu1 }
 0x267   :  { %2267 = vst.msk [vmem:[%s4121_s7 + $0x58] sm:$0xff] %vm2255_vm1, %v1992_v56  ;;  %v1987_v22 = vadd.f32 %v3752_v30, %v1986_v27 }
 0x268   :  { %v2675_v0 = vpop.f32.mrf.mxu0  ;;  %v2719_v28 = vpop.f32.mrf.mxu1 }
 0x269   :  { %2266 = vst.msk [vmem:[%s4121_s7 + $0x50] sm:$0xff] %vm2255_vm1, %v1987_v22  ;;  %v2002_v29 = vadd.f32 %v2719_v28, %v3752_v30  ;;  %v1530_v16 = vadd.f32 %v2675_v0, %v3575_v38 }
 0x26a   :  { %v1524_v31 = vpop.f32.mrf.mxu0  ;;  %v1996_v61 = vpop.f32.mrf.mxu1 }
 0x26b   :  { %2269 = vst.msk [vmem:[%s4121_s7 + $0x68] sm:$0xff] %vm2255_vm1, %v2002_v29  ;;  %v1525_v32 = vadd.f32 %v3575_v38, %v1524_v31  ;;  %v1997_v48 = vadd.f32 %v3752_v30, %v1996_v61  ;;  %v1652_v33 = vmax.f32 %v1530_v16, 0.0 }
 0x26c   :  { %v2722_v1 = vpop.f32.mrf.mxu1 }
 0x26d   :  { %v1651_v46 = vmax.f32 %v1525_v32, 0.0  ;;  %2268 = vst.msk [vmem:[%s4121_s7 + $0x60] sm:$0xff] %vm2255_vm1, %v1997_v48  ;;  %v2012_v25 = vadd.f32 %v2722_v1, %v3752_v30 }
 0x26e   :  { %v2006_v42 = vpop.f32.mrf.mxu1 }
 0x26f   :  { %2271 = vst.msk [vmem:[%s4121_s7 + $0x78] sm:$0xff] %vm2255_vm1, %v2012_v25  ;;  %v2007_v17 = vadd.f32 %v3752_v30, %v2006_v42  ;;  %2771 = vmatprep.mubr.msk.f32.mxu1 %vm1013_vm0, %v1651_v46 }
 0x270   :  { %v2725_v13 = vpop.f32.mrf.mxu1  ;;  %2772 = vmatmul.mubr.msk.f32.gmra.mxu1 %vm1013_vm0, %v1652_v33 }
 0x271   :  { %2270 = vst.msk [vmem:[%s4121_s7 + $0x70] sm:$0xff] %vm2255_vm1, %v2007_v17  ;;  %v2022_v2 = vadd.f32 %v2725_v13, %v3752_v30 }
 0x272   :  { %v2678_v18 = vpop.f32.mrf.mxu0  ;;  %v2016_v34 = vpop.f32.mrf.mxu1 }
 0x273   :  { %2273 = vst.msk [vmem:[%s4121_s7 + $0x88] sm:$0xff] %vm2255_vm1, %v2022_v2  ;;  %v2017_v36 = vadd.f32 %v3752_v30, %v2016_v34  ;;  %v1540_v52 = vadd.f32 %v2678_v18, %v3575_v38 }
 0x274   :  { %v1534_v12 = vpop.f32.mrf.mxu0 }
 0x275   :  { %2272 = vst.msk [vmem:[%s4121_s7 + $0x80] sm:$0xff] %vm2255_vm1, %v2017_v36  ;;  %v1535_v37 = vadd.f32 %v3575_v38, %v1534_v12  ;;  %v1654_v63 = vmax.f32 %v1540_v52, 0.0 }
 0x277   :  { %v1653_v9 = vmax.f32 %v1535_v37, 0.0 }
 0x279   :  { %2774 = vmatprep.mubr.msk.f32.mxu1 %vm1013_vm0, %v1653_v9 }
 0x27a   :  { %v2728_v39 = vpop.f32.mrf.mxu1  ;;  %2775 = vmatmul.mubr.msk.f32.gmra.mxu1 %vm1013_vm0, %v1654_v63 }
 0x27b   :  { %v2032_v43 = vadd.f32 %v2728_v39, %v3752_v30 }
 0x27c   :  { %v2026_v60 = vpop.f32.mrf.mxu1 }
 0x27d   :  { %2275 = vst.msk [vmem:[%s4121_s7 + $0x98] sm:$0xff] %vm2255_vm1, %v2032_v43  ;;  %v2027_v40 = vadd.f32 %v3752_v30, %v2026_v60 }
 0x27f   :  { %2274 = vst.msk [vmem:[%s4121_s7 + $0x90] sm:$0xff] %vm2255_vm1, %v2027_v40 }
 0x280   :  { %v2681_v6 = vpop.f32.mrf.mxu0 }
 0x281   :  { %v1550_v50 = vadd.f32 %v2681_v6, %v3575_v38 }
 0x282   :  { %v1544_v57 = vpop.f32.mrf.mxu0 }
 0x283   :  { %v1545_v45 = vadd.f32 %v3575_v38, %v1544_v57  ;;  %v1656_v58 = vmax.f32 %v1550_v50, 0.0 }
 0x285   :  { %v1655_v4 = vmax.f32 %v1545_v45, 0.0 }
 0x287   :  { %2777 = vmatprep.mubr.msk.f32.mxu1 %vm1013_vm0, %v1655_v4 }
 0x288   :  { %v2731_v59 = vpop.f32.mrf.mxu1  ;;  %2778 = vmatmul.mubr.msk.f32.gmra.mxu1 %vm1013_vm0, %v1656_v58 }
 0x289   :  { %v2042_v3 = vadd.f32 %v2731_v59, %v3752_v30 }
 0x28a   :  { %v2684_v47 = vpop.f32.mrf.mxu0  ;;  %v2036_v11 = vpop.f32.mrf.mxu1 }
 0x28b   :  { %2277 = vst.msk [vmem:[%s4121_s7 + $0xa8] sm:$0xff] %vm2255_vm1, %v2042_v3  ;;  %v2037_v10 = vadd.f32 %v3752_v30, %v2036_v11  ;;  %v1560_v35 = vadd.f32 %v2684_v47, %v3575_v38 }
 0x28c   :  { %v1554_v8 = vpop.f32.mrf.mxu0 }
 0x28d   :  { %2276 = vst.msk [vmem:[%s4121_s7 + $0xa0] sm:$0xff] %vm2255_vm1, %v2037_v10  ;;  %v1555_v62 = vadd.f32 %v3575_v38, %v1554_v8  ;;  %v1658_v53 = vmax.f32 %v1560_v35, 0.0 }
 0x28f   :  { %v1657_v14 = vmax.f32 %v1555_v62, 0.0 }
 0x291   :  { %2780 = vmatprep.mubr.msk.f32.mxu1 %vm1013_vm0, %v1657_v14 }
 0x292   :  { %v2734_v23 = vpop.f32.mrf.mxu1  ;;  %2781 = vmatmul.mubr.msk.f32.gmra.mxu1 %vm1013_vm0, %v1658_v53 }
 0x293   :  { %v2052_v26 = vadd.f32 %v2734_v23, %v3752_v30 }
 0x294   :  { %v2046_v5 = vpop.f32.mrf.mxu1 }
 0x295   :  { %2279 = vst.msk [vmem:[%s4121_s7 + $0xb8] sm:$0xff] %vm2255_vm1, %v2052_v26  ;;  %v2047_v41 = vadd.f32 %v3752_v30, %v2046_v5 }
 0x297   :  { %2278 = vst.msk [vmem:[%s4121_s7 + $0xb0] sm:$0xff] %vm2255_vm1, %v2047_v41 }
 0x298   :  { %v2687_v15 = vpop.f32.mrf.mxu0 }
 0x299   :  { %v1570_v49 = vadd.f32 %v2687_v15, %v3575_v38 }
 0x29a   :  { %v1564_v51 = vpop.f32.mrf.mxu0 }
 0x29b   :  { %v1565_v44 = vadd.f32 %v3575_v38, %v1564_v51  ;;  %v1660_v55 = vmax.f32 %v1570_v49, 0.0 }
 0x29d   :  { %v1659_v24 = vmax.f32 %v1565_v44, 0.0 }
 0x29f   :  { %2783 = vmatprep.mubr.msk.f32.mxu1 %vm1013_vm0, %v1659_v24 }
 0x2a0   :  { %v2737_v7 = vpop.f32.mrf.mxu1  ;;  %2784 = vmatmul.mubr.msk.f32.gmra.mxu1 %vm1013_vm0, %v1660_v55 }
 0x2a1   :  { %v2062_v19 = vadd.f32 %v2737_v7, %v3752_v30 }
 0x2a2   :  { %v2690_v21 = vpop.f32.mrf.mxu0  ;;  %v2056_v54 = vpop.f32.mrf.mxu1 }
 0x2a3   :  { %2281 = vst.msk [vmem:[%s4121_s7 + $0xc8] sm:$0xff] %vm2255_vm1, %v2062_v19  ;;  %v2057_v20 = vadd.f32 %v3752_v30, %v2056_v54  ;;  %v1580_v56 = vadd.f32 %v2690_v21, %v3575_v38 }
 0x2a4   :  { %v1574_v27 = vpop.f32.mrf.mxu0 }
 0x2a5   :  { %2280 = vst.msk [vmem:[%s4121_s7 + $0xc0] sm:$0xff] %vm2255_vm1, %v2057_v20  ;;  %v1575_v22 = vadd.f32 %v3575_v38, %v1574_v27  ;;  %v1662_v28 = vmax.f32 %v1580_v56, 0.0 }
 0x2a7   :  { %v1661_v0 = vmax.f32 %v1575_v22, 0.0 }
 0x2a9   :  { %2786 = vmatprep.mubr.msk.f32.mxu1 %vm1013_vm0, %v1661_v0 }
 0x2aa   :  { %v2740_v29 = vpop.f32.mrf.mxu1  ;;  %2787 = vmatmul.mubr.msk.f32.gmra.mxu1 %vm1013_vm0, %v1662_v28 }
 0x2ab   :  { %v2072_v16 = vadd.f32 %v2740_v29, %v3752_v30 }
 0x2ac   :  { %v2066_v31 = vpop.f32.mrf.mxu1 }
 0x2ad   :  { %2283 = vst.msk [vmem:[%s4121_s7 + $0xd8] sm:$0xff] %vm2255_vm1, %v2072_v16  ;;  %v2067_v61 = vadd.f32 %v3752_v30, %v2066_v31 }
 0x2af   :  { %2282 = vst.msk [vmem:[%s4121_s7 + $0xd0] sm:$0xff] %vm2255_vm1, %v2067_v61 }
 0x2b0   :  { %v2693_v32 = vpop.f32.mrf.mxu0 }
 0x2b1   :  { %v1590_v48 = vadd.f32 %v2693_v32, %v3575_v38 }
 0x2b2   :  { %v1584_v1 = vpop.f32.mrf.mxu0 }
 0x2b3   :  { %v1585_v46 = vadd.f32 %v3575_v38, %v1584_v1  ;;  %v1664_v33 = vmax.f32 %v1590_v48, 0.0 }
 0x2b5   :  { %v1663_v25 = vmax.f32 %v1585_v46, 0.0 }
 0x2b7   :  { %2789 = vmatprep.mubr.msk.f32.mxu1 %vm1013_vm0, %v1663_v25 }
 0x2b8   :  { %v2743_v42 = vpop.f32.mrf.mxu1  ;;  %2790 = vmatmul.mubr.msk.f32.gmra.mxu1 %vm1013_vm0, %v1664_v33 }
 0x2b9   :  { %v2082_v17 = vadd.f32 %v2743_v42, %v3752_v30 }
 0x2ba   :  { %v2696_v13 = vpop.f32.mrf.mxu0  ;;  %v2076_v2 = vpop.f32.mrf.mxu1 }
 0x2bb   :  { %2285 = vst.msk [vmem:[%s4121_s7 + $0xe8] sm:$0xff] %vm2255_vm1, %v2082_v17  ;;  %v2077_v18 = vadd.f32 %v3752_v30, %v2076_v2  ;;  %v1600_v34 = vadd.f32 %v2696_v13, %v3575_v38 }
 0x2bc   :  { %v1594_v36 = vpop.f32.mrf.mxu0 }
 0x2bd   :  { %2284 = vst.msk [vmem:[%s4121_s7 + $0xe0] sm:$0xff] %vm2255_vm1, %v2077_v18  ;;  %v1595_v52 = vadd.f32 %v3575_v38, %v1594_v36  ;;  %v1666_v37 = vmax.f32 %v1600_v34, 0.0 }
 0x2bf   :  { %v1665_v12 = vmax.f32 %v1595_v52, 0.0 }
 0x2c1   :  { %2792 = vmatprep.mubr.msk.f32.mxu1 %vm1013_vm0, %v1665_v12 }
 0x2c2   :  { %v2746_v9 = vpop.f32.mrf.mxu1  ;;  %2793 = vmatmul.mubr.msk.f32.gmra.mxu1 %vm1013_vm0, %v1666_v37 }
 0x2c3   :  { %v2092_v63 = vadd.f32 %v2746_v9, %v3752_v30 }
 0x2c4   :  { %v2086_v39 = vpop.f32.mrf.mxu1 }
 0x2c5   :  { %2287 = vst.msk [vmem:[%s4121_s7 + $0xf8] sm:$0xff] %vm2255_vm1, %v2092_v63  ;;  %v2087_v43 = vadd.f32 %v3752_v30, %v2086_v39 }
 0x2c7   :  { %2286 = vst.msk [vmem:[%s4121_s7 + $0xf0] sm:$0xff] %vm2255_vm1, %v2087_v43 }
 0x2d0   :  { %v2749_v38 = vpop.f32.mrf.mxu1 }
 0x2d1   :  { %v2102_v60 = vadd.f32 %v2749_v38, %v3752_v30 }
 0x2d2   :  { %v2096_v40 = vpop.f32.mrf.mxu1 }
 0x2d3   :  { %2289 = vst.msk [vmem:[%s4121_s7 + $0x108] sm:$0xff] %vm2255_vm1, %v2102_v60  ;;  %v2097_v6 = vadd.f32 %v3752_v30, %v2096_v40 }
 0x2d5   :  { %2288 = vst.msk [vmem:[%s4121_s7 + $0x100] sm:$0xff] %vm2255_vm1, %v2097_v6 }
 0x2da   :  { %v2752_v50 = vpop.f32.mrf.mxu1 }
 0x2db   :  { %v2112_v57 = vadd.f32 %v2752_v50, %v3752_v30 }
 0x2dc   :  { %v2106_v45 = vpop.f32.mrf.mxu1 }
 0x2dd   :  { %2291 = vst.msk [vmem:[%s4121_s7 + $0x118] sm:$0xff] %vm2255_vm1, %v2112_v57  ;;  %v2107_v4 = vadd.f32 %v3752_v30, %v2106_v45 }
 0x2df   :  { %2290 = vst.msk [vmem:[%s4121_s7 + $0x110] sm:$0xff] %vm2255_vm1, %v2107_v4 }
 0x2e8   :  { %v2755_v58 = vpop.f32.mrf.mxu1 }
 0x2e9   :  { %v2122_v59 = vadd.f32 %v2755_v58, %v3752_v30 }
 0x2ea   :  { %v2116_v3 = vpop.f32.mrf.mxu1 }
 0x2eb   :  { %2293 = vst.msk [vmem:[%s4121_s7 + $0x128] sm:$0xff] %vm2255_vm1, %v2122_v59  ;;  %v2117_v47 = vadd.f32 %v3752_v30, %v2116_v3 }
 0x2ed   :  { %2292 = vst.msk [vmem:[%s4121_s7 + $0x120] sm:$0xff] %vm2255_vm1, %v2117_v47 }
 0x2f2   :  { %v2758_v11 = vpop.f32.mrf.mxu1 }
 0x2f3   :  { %v2132_v10 = vadd.f32 %v2758_v11, %v3752_v30 }
 0x2f4   :  { %v2126_v35 = vpop.f32.mrf.mxu1 }
 0x2f5   :  { %2295 = vst.msk [vmem:[%s4121_s7 + $0x138] sm:$0xff] %vm2255_vm1, %v2132_v10  ;;  %v2127_v8 = vadd.f32 %v3752_v30, %v2126_v35 }
 0x2f7   :  { %2294 = vst.msk [vmem:[%s4121_s7 + $0x130] sm:$0xff] %vm2255_vm1, %v2127_v8 }
 0x300   :  { %v2761_v62 = vpop.f32.mrf.mxu1 }
 0x301   :  { %v2142_v14 = vadd.f32 %v2761_v62, %v3752_v30 }
 0x302   :  { %v2136_v53 = vpop.f32.mrf.mxu1 }
 0x303   :  { %2297 = vst.msk [vmem:[%s4121_s7 + $0x148] sm:$0xff] %vm2255_vm1, %v2142_v14  ;;  %v2137_v23 = vadd.f32 %v3752_v30, %v2136_v53 }
 0x305   :  { %2296 = vst.msk [vmem:[%s4121_s7 + $0x140] sm:$0xff] %vm2255_vm1, %v2137_v23 }
 0x30a   :  { %v2764_v26 = vpop.f32.mrf.mxu1 }
 0x30b   :  { %v2152_v5 = vadd.f32 %v2764_v26, %v3752_v30 }
 0x30c   :  { %v2146_v41 = vpop.f32.mrf.mxu1 }
 0x30d   :  { %2299 = vst.msk [vmem:[%s4121_s7 + $0x158] sm:$0xff] %vm2255_vm1, %v2152_v5  ;;  %v2147_v15 = vadd.f32 %v3752_v30, %v2146_v41 }
 0x30f   :  { %2298 = vst.msk [vmem:[%s4121_s7 + $0x150] sm:$0xff] %vm2255_vm1, %v2147_v15 }
 0x318   :  { %v2767_v49 = vpop.f32.mrf.mxu1 }
 0x319   :  { %v2162_v51 = vadd.f32 %v2767_v49, %v3752_v30 }
 0x31a   :  { %v2156_v44 = vpop.f32.mrf.mxu1 }
 0x31b   :  { %2301 = vst.msk [vmem:[%s4121_s7 + $0x168] sm:$0xff] %vm2255_vm1, %v2162_v51  ;;  %v2157_v24 = vadd.f32 %v3752_v30, %v2156_v44 }
 0x31d   :  { %2300 = vst.msk [vmem:[%s4121_s7 + $0x160] sm:$0xff] %vm2255_vm1, %v2157_v24 }
 0x322   :  { %v2770_v55 = vpop.f32.mrf.mxu1 }
 0x323   :  { %v2172_v7 = vadd.f32 %v2770_v55, %v3752_v30 }
 0x324   :  { %v2166_v19 = vpop.f32.mrf.mxu1 }
 0x325   :  { %2303 = vst.msk [vmem:[%s4121_s7 + $0x178] sm:$0xff] %vm2255_vm1, %v2172_v7  ;;  %v2167_v21 = vadd.f32 %v3752_v30, %v2166_v19 }
 0x327   :  { %2302 = vst.msk [vmem:[%s4121_s7 + $0x170] sm:$0xff] %vm2255_vm1, %v2167_v21 }
 0x330   :  { %v2773_v54 = vpop.f32.mrf.mxu1 }
 0x331   :  { %v2182_v20 = vadd.f32 %v2773_v54, %v3752_v30 }
 0x332   :  { %v2176_v56 = vpop.f32.mrf.mxu1 }
 0x333   :  { %2305 = vst.msk [vmem:[%s4121_s7 + $0x188] sm:$0xff] %vm2255_vm1, %v2182_v20  ;;  %v2177_v27 = vadd.f32 %v3752_v30, %v2176_v56 }
 0x335   :  { %2304 = vst.msk [vmem:[%s4121_s7 + $0x180] sm:$0xff] %vm2255_vm1, %v2177_v27 }
 0x33a   :  { %v2776_v22 = vpop.f32.mrf.mxu1 }
 0x33b   :  { %v2192_v0 = vadd.f32 %v2776_v22, %v3752_v30 }
 0x33c   :  { %v2186_v28 = vpop.f32.mrf.mxu1 }
 0x33d   :  { %2307 = vst.msk [vmem:[%s4121_s7 + $0x198] sm:$0xff] %vm2255_vm1, %v2192_v0  ;;  %v2187_v29 = vadd.f32 %v3752_v30, %v2186_v28 }
 0x33f   :  { %2306 = vst.msk [vmem:[%s4121_s7 + $0x190] sm:$0xff] %vm2255_vm1, %v2187_v29 }
 0x348   :  { %v2779_v16 = vpop.f32.mrf.mxu1 }
 0x349   :  { %v2202_v31 = vadd.f32 %v2779_v16, %v3752_v30 }
 0x34a   :  { %v2196_v61 = vpop.f32.mrf.mxu1 }
 0x34b   :  { %2309 = vst.msk [vmem:[%s4121_s7 + $0x1a8] sm:$0xff] %vm2255_vm1, %v2202_v31  ;;  %v2197_v32 = vadd.f32 %v3752_v30, %v2196_v61 }
 0x34d   :  { %2308 = vst.msk [vmem:[%s4121_s7 + $0x1a0] sm:$0xff] %vm2255_vm1, %v2197_v32 }
 0x352   :  { %v2782_v48 = vpop.f32.mrf.mxu1 }
 0x353   :  { %v2212_v1 = vadd.f32 %v2782_v48, %v3752_v30 }
 0x354   :  { %v2206_v46 = vpop.f32.mrf.mxu1 }
 0x355   :  { %2311 = vst.msk [vmem:[%s4121_s7 + $0x1b8] sm:$0xff] %vm2255_vm1, %v2212_v1  ;;  %v2207_v25 = vadd.f32 %v3752_v30, %v2206_v46 }
 0x357   :  { %2310 = vst.msk [vmem:[%s4121_s7 + $0x1b0] sm:$0xff] %vm2255_vm1, %v2207_v25 }
 0x360   :  { %v2785_v33 = vpop.f32.mrf.mxu1 }
 0x361   :  { %v2222_v42 = vadd.f32 %v2785_v33, %v3752_v30 }
 0x362   :  { %v2216_v17 = vpop.f32.mrf.mxu1 }
 0x363   :  { %2313 = vst.msk [vmem:[%s4121_s7 + $0x1c8] sm:$0xff] %vm2255_vm1, %v2222_v42  ;;  %v2217_v13 = vadd.f32 %v3752_v30, %v2216_v17 }
 0x365   :  { %2312 = vst.msk [vmem:[%s4121_s7 + $0x1c0] sm:$0xff] %vm2255_vm1, %v2217_v13 }
 0x36a   :  { %v2788_v2 = vpop.f32.mrf.mxu1 }
 0x36b   :  { %v2232_v18 = vadd.f32 %v2788_v2, %v3752_v30 }
 0x36c   :  { %v2226_v34 = vpop.f32.mrf.mxu1 }
 0x36d   :  { %2315 = vst.msk [vmem:[%s4121_s7 + $0x1d8] sm:$0xff] %vm2255_vm1, %v2232_v18  ;;  %v2227_v36 = vadd.f32 %v3752_v30, %v2226_v34 }
 0x36f   :  { %2314 = vst.msk [vmem:[%s4121_s7 + $0x1d0] sm:$0xff] %vm2255_vm1, %v2227_v36 }
 0x378   :  { %v2791_v52 = vpop.f32.mrf.mxu1 }
 0x379   :  { %v2242_v12 = vadd.f32 %v2791_v52, %v3752_v30 }
 0x37a   :  { %v2236_v37 = vpop.f32.mrf.mxu1 }
 0x37b   :  { %2317 = vst.msk [vmem:[%s4121_s7 + $0x1e8] sm:$0xff] %vm2255_vm1, %v2242_v12  ;;  %v2237_v9 = vadd.f32 %v3752_v30, %v2236_v37 }
 0x37d   :  { %2316 = vst.msk [vmem:[%s4121_s7 + $0x1e0] sm:$0xff] %vm2255_vm1, %v2237_v9 }
 0x382   :  { %v2794_v63 = vpop.f32.mrf.mxu1 }
 0x383   :  { %v2252_v39 = vadd.f32 %v2794_v63, %v3752_v30 }
 0x384   :  { %v2246_v43 = vpop.f32.mrf.mxu1 }
 0x385   :  { %2319 = vst.msk [vmem:[%s4121_s7 + $0x1f8] sm:$0xff] %vm2255_vm1, %v2252_v39  ;;  %v2247_v38 = vadd.f32 %v3752_v30, %v2246_v43 }
 0x387   :  { %2318 = vst.msk [vmem:[%s4121_s7 + $0x1f0] sm:$0xff] %vm2255_vm1, %v2247_v38 }

</bundles_post_ra>
